<compile_context>
chip_gen: v7x
topology: tpu7x:2x2x1
jax: 0.10.0
libtpu: 0.0.40
codegen_flags: <defaults>
</compile_context>

<pallas_src>
import jax
import jax.numpy as jnp
from jax.experimental import pallas as pl
from jax.experimental.pallas import tpu as pltpu


def _round_up(x, m):
    return (x + m - 1) // m * m


# -----------------------------------------------------------------------------
# Kernel 1: fused matmul  out = PReLU_alpha(x @ w + b)   (K fully collapsed)
# Used for the 4 stride-2 convs (via small im2col) and the linear heads.
# -----------------------------------------------------------------------------
def _mm_kernel(x_ref, w_ref, b_ref, a_ref, o_ref):
    y = jnp.dot(x_ref[...], w_ref[...], preferred_element_type=jnp.float32)
    y = y + b_ref[...]
    y = jnp.where(y >= 0.0, y, a_ref[...] * y)      # PReLU (alpha=1 -> identity)
    o_ref[...] = y.astype(o_ref.dtype)


def fused_matmul(x, w, bias, alpha, *, out_dtype=jnp.bfloat16, max_tm=512):
    """out = PReLU_alpha(x @ w + bias).  x: (M, K), w: (K, Cout)."""
    M, K = x.shape
    Kw, Cout = w.shape
    assert Kw == K

    # M tiling: full M in one block, or an exact multiple-of-8 divisor of M.
    if M <= max_tm:
        tm, Mp = M, M
    else:
        tm = None
        t = (max_tm // 8) * 8
        while t >= 8:
            if M % t == 0:
                tm = t
                break
            t -= 8
        if tm is None:                       # fallback (not hit by this network)
            tm = (max_tm // 8) * 8
        Mp = _round_up(M, tm)
    n_m = Mp // tm

    # Cout tiling: full Cout, unless splitting keeps >=2 parallel blocks (v7x 2 TCs).
    if Cout % 128 != 0:
        tn = Cout
    elif n_m == 1 and Cout >= 256:
        tn = Cout // 2
    else:
        tn = min(Cout, 512)
    n_c = Cout // tn

    x = x.astype(jnp.bfloat16)
    w = w.astype(jnp.bfloat16)
    if Mp != M:
        x = jnp.pad(x, ((0, Mp - M), (0, 0)))
    b2 = bias.astype(jnp.float32).reshape(1, Cout)
    a2 = alpha.astype(jnp.float32).reshape(1, Cout)

    out = pl.pallas_call(
        _mm_kernel,
        out_shape=jax.ShapeDtypeStruct((Mp, Cout), out_dtype),
        grid_spec=pltpu.PrefetchScalarGridSpec(
            num_scalar_prefetch=0,
            grid=(n_m, n_c),
            in_specs=[
                pl.BlockSpec((tm, K), lambda i, j: (i, 0)),
                pl.BlockSpec((K, tn), lambda i, j: (0, j)),
                pl.BlockSpec((1, tn), lambda i, j: (0, j)),
                pl.BlockSpec((1, tn), lambda i, j: (0, j)),
            ],
            out_specs=pl.BlockSpec((tm, tn), lambda i, j: (i, j)),
        ),
        compiler_params=pltpu.CompilerParams(
            dimension_semantics=("parallel", "parallel")),
    )(x, w, b2, a2)
    if Mp != M:
        out = out[:M]
    return out


# -----------------------------------------------------------------------------
# Kernel 2: direct 3x3 stride-1 conv + bias + PReLU [+ fused residual add].
# Reads the padded activation once per image; im2col is built in VMEM from 9
# shifted slices of the flattened (Hpad*W8, Cin) plane.
# -----------------------------------------------------------------------------
def conv3x3_s1(x, w_mat, bias, alpha, residual=None):
    """x: (N, H, W, Cin); w_mat: (9*Cin, Cout) rows ordered (kh, kw, cin);
    residual (optional): (N, H, W, Cout).  Returns (N, H, W, Cout) bf16."""
    N, H, W, Cin = x.shape
    Cout = w_mat.shape[1]
    W8 = _round_up(W + 2, 8)     # row pitch, multiple of 8 => layout-safe reshape
    Hp = H + 3                   # top pad 1, bottom pad 2 (conv pad + OOB slack)
    Mg = H * W8                  # "garbage grid": W8 - W extra cols dropped in-kernel
    tn = Cout if Cout <= 256 else 256
    n_c = Cout // tn
    has_res = residual is not None

    xp = jnp.pad(x.astype(jnp.bfloat16),
                 ((0, 0), (1, 2), (1, W8 - W - 1), (0, 0)))
    xf = xp.reshape(N, Hp * W8, Cin)
    b2 = bias.astype(jnp.float32).reshape(1, Cout)
    a2 = alpha.astype(jnp.float32).reshape(1, Cout)

    def kernel(*refs):
        if has_res:
            x_ref, w_ref, b_ref, a_ref, r_ref, o_ref = refs
        else:
            x_ref, w_ref, b_ref, a_ref, o_ref = refs
        # In-VMEM im2col: 9 shifted views of the flattened padded plane.
        cols = [x_ref[pl.ds(kh * W8 + kw, Mg), :]
                for kh in range(3) for kw in range(3)]
        xcol = jnp.concatenate(cols, axis=-1)            # (Mg, 9*Cin) bf16
        y = jnp.dot(xcol, w_ref[...], preferred_element_type=jnp.float32)
        y = y + b_ref[...]
        y = jnp.where(y >= 0.0, y, a_ref[...] * y)       # PReLU
        y = y.reshape(H, W8, tn)[:, :W, :]               # drop garbage columns
        if has_res:
            y = y + r_ref[...].astype(jnp.float32)       # fused residual add
        o_ref[...] = y.astype(o_ref.dtype)

    in_specs = [
        pl.BlockSpec((None, Hp * W8, Cin), lambda n, j: (n, 0, 0)),
        pl.BlockSpec((9 * Cin, tn), lambda n, j: (0, j)),
        pl.BlockSpec((1, tn), lambda n, j: (0, j)),
        pl.BlockSpec((1, tn), lambda n, j: (0, j)),
    ]
    args = [xf, w_mat.astype(jnp.bfloat16), b2, a2]
    if has_res:
        in_specs.append(pl.BlockSpec((None, H, W, tn), lambda n, j: (n, 0, 0, j)))
        args.append(residual.astype(jnp.bfloat16))

    return pl.pallas_call(
        kernel,
        out_shape=jax.ShapeDtypeStruct((N, H, W, Cout), jnp.bfloat16),
        grid_spec=pltpu.PrefetchScalarGridSpec(
            num_scalar_prefetch=0,
            grid=(N, n_c),
            in_specs=in_specs,
            out_specs=pl.BlockSpec((None, H, W, tn), lambda n, j: (n, 0, 0, j)),
        ),
        compiler_params=pltpu.CompilerParams(
            dimension_semantics=("parallel", "parallel")),
    )(*args)


# -----------------------------------------------------------------------------
# Stride-2 convs: small im2col (patches are tiny for these 4 layers) + matmul.
# -----------------------------------------------------------------------------
def _im2col(x, k, stride, pad):
    """x: (N, H, W, C) -> (N, Ho, Wo, k*k*C), tap order (kh, kw, cin)."""
    N, H, W, C = x.shape
    Ho = (H + 2 * pad - k) // stride + 1
    Wo = (W + 2 * pad - k) // stride + 1
    xp = jnp.pad(x, ((0, 0), (pad, pad), (pad, pad), (0, 0)))
    cols = []
    for kh in range(k):
        for kw in range(k):
            cols.append(xp[:, kh:kh + stride * Ho:stride,
                           kw:kw + stride * Wo:stride, :])
    return jnp.concatenate(cols, axis=-1), Ho, Wo


def conv3x3_s2(x, w_mat, bias, alpha):
    N = x.shape[0]
    Cout = w_mat.shape[1]
    patches, Ho, Wo = _im2col(x.astype(jnp.bfloat16), 3, 2, 1)
    out = fused_matmul(patches.reshape(N * Ho * Wo, -1), w_mat, bias, alpha)
    return out.reshape(N, Ho, Wo, Cout)


# --------------------------- parameter construction ---------------------------
_CONV_SPECS = [
    ("conv1_1", 3, 64, 2), ("conv1_2", 64, 64, 1), ("conv1_3", 64, 64, 1),
    ("conv2_1", 64, 128, 2), ("conv2_2", 128, 128, 1), ("conv2_3", 128, 128, 1),
    ("conv2_4", 128, 128, 1), ("conv2_5", 128, 128, 1),
    ("conv3_1", 128, 256, 2), ("conv3_2", 256, 256, 1), ("conv3_3", 256, 256, 1),
    ("conv3_4", 256, 256, 1), ("conv3_5", 256, 256, 1), ("conv3_6", 256, 256, 1),
    ("conv3_7", 256, 256, 1), ("conv3_8", 256, 256, 1), ("conv3_9", 256, 256, 1),
    ("conv4_1", 256, 512, 2), ("conv4_2", 512, 512, 1), ("conv4_3", 512, 512, 1),
]


def init_params(key, nef):
    params = {}
    for (name, cin, cout, stride) in _CONV_SPECS:
        key, kw_, kb_ = jax.random.split(key, 3)
        fan_in = cin * 9
        w = jax.random.normal(kw_, (cout, cin, 3, 3), jnp.float32) / jnp.sqrt(
            jnp.float32(fan_in))
        # (Cout,Cin,kh,kw) -> (kh,kw,Cin,Cout) -> (9*Cin, Cout): matches the
        # (kh, kw, cin) im2col/tap order used by both conv paths.
        wm = jnp.transpose(w, (2, 3, 1, 0)).reshape(9 * cin, cout).astype(
            jnp.bfloat16)
        b = 0.01 * jax.random.normal(kb_, (cout,), jnp.float32)
        a = jnp.full((cout,), 0.25, jnp.float32)        # PReLU default slope
        params[name] = dict(w=wm, b=b, a=a, stride=stride)

    def linear(key, fi, fo):
        kw_, kb_ = jax.random.split(key)
        w = jax.random.normal(kw_, (fi, fo), jnp.float32) / jnp.sqrt(jnp.float32(fi))
        b = 0.01 * jax.random.normal(kb_, (fo,), jnp.float32)
        return w, b

    key, k1, k2, k3 = jax.random.split(key, 4)
    w_fc5, b_fc5 = linear(k1, 512 * 7 * 6, 512)
    w_emb, b_emb = linear(k2, 512, nef)
    # Algebraic fold of fc5 -> emb_cnn_code (both activation-free linears):
    # compose in f32, cast once to bf16.
    params["head"] = dict(w=(w_fc5 @ w_emb).astype(jnp.bfloat16),
                          b=(b_fc5 @ w_emb + b_emb).astype(jnp.float32))
    w_ef, b_ef = linear(k3, 256, nef)                   # 1x1 conv as matmul
    params["emb_features"] = dict(w=w_ef.astype(jnp.bfloat16), b=b_ef)
    return params


# ----------------------------------- forward ----------------------------------
def cnn_encoder_sphere_forward(x_nchw, params, nef):
    """x_nchw: (N, 3, H, W) -> (features (N, nef, 14, 12), cnn_code (N, nef))."""
    N = x_nchw.shape[0]
    x = jnp.transpose(x_nchw, (0, 2, 3, 1))                     # NHWC
    # TODO(synk): bilinear upsample stays plain-JAX glue (no Pallas equivalent).
    x = jax.image.resize(x, (N, 112, 96, x.shape[-1]), method="bilinear")
    x = x.astype(jnp.bfloat16)

    def s2(x, name):
        p = params[name]
        return conv3x3_s2(x, p["w"], p["b"], p["a"])

    def s1(x, name, residual=None):
        p = params[name]
        return conv3x3_s1(x, p["w"], p["b"], p["a"], residual=residual)

    # stage 1
    x = s2(x, "conv1_1")                                        # (N,56,48,64)
    x = s1(s1(x, "conv1_2"), "conv1_3", residual=x)
    # stage 2
    x = s2(x, "conv2_1")                                        # (N,28,24,128)
    x = s1(s1(x, "conv2_2"), "conv2_3", residual=x)
    x = s1(s1(x, "conv2_4"), "conv2_5", residual=x)
    # stage 3
    x = s2(x, "conv3_1")                                        # (N,14,12,256)
    x = s1(s1(x, "conv3_2"), "conv3_3", residual=x)
    x = s1(s1(x, "conv3_4"), "conv3_5", residual=x)
    x = s1(s1(x, "conv3_6"), "conv3_7", residual=x)
    x = s1(s1(x, "conv3_8"), "conv3_9", residual=x)
    features = x
    # stage 4
    x = s2(x, "conv4_1")                                        # (N,7,6,512)
    x = s1(s1(x, "conv4_2"), "conv4_3", residual=x)

    # fc5 -> emb_cnn_code (folded).  Flatten exactly like PyTorch view on NCHW.
    xf = jnp.transpose(x, (0, 3, 1, 2)).reshape(N, 512 * 7 * 6)
    ones_nef = jnp.ones((nef,), jnp.float32)
    cnn_code = fused_matmul(xf, params["head"]["w"], params["head"]["b"],
                            ones_nef, out_dtype=jnp.float32)

    # emb_features: 1x1 conv 256 -> nef (bias, no activation)
    fm = features.reshape(N * 14 * 12, 256)
    fe = fused_matmul(fm, params["emb_features"]["w"],
                      params["emb_features"]["b"], ones_nef,
                      out_dtype=jnp.float32)
    features_out = jnp.transpose(fe.reshape(N, 14, 12, nef), (0, 3, 1, 2))
    return features_out, cnn_code


# ------------------------------------ main -------------------------------------
if __name__ == "__main__":
    key = jax.random.PRNGKey(0)
    kx, kp, kt = jax.random.split(key, 3)

    nef = 32
    N = 2
    x = jax.random.normal(kx, (N, 3, 32, 32), jnp.float32)      # NCHW input
    params = init_params(kp, nef)

    # -- small tolerance checks of both kernels against f32 references ----------
    k1, k2, k3, k4 = jax.random.split(kt, 4)
    xt = jax.random.normal(k1, (2, 8, 8, 128), jnp.float32).astype(jnp.bfloat16)
    wt = (jax.random.normal(k2, (9 * 128, 128), jnp.float32) / 32.0).astype(
        jnp.bfloat16)
    bt = 0.01 * jax.random.normal(k3, (128,), jnp.float32)
    at = jnp.full((128,), 0.25, jnp.float32)
    rt = jax.random.normal(k4, (2, 8, 8, 128), jnp.float32).astype(jnp.bfloat16)

    got = conv3x3_s1(xt, wt, bt, at, residual=rt).astype(jnp.float32)
    cols, _, _ = _im2col(xt.astype(jnp.float32), 3, 1, 1)
    ref = cols.reshape(-1, 9 * 128) @ wt.astype(jnp.float32) + bt
    ref = jnp.where(ref >= 0, ref, at * ref).reshape(2, 8, 8, 128)
    ref = ref + rt.astype(jnp.float32)
    err = float(jnp.max(jnp.abs(got - ref)))
    assert err < 0.1, f"conv3x3_s1 mismatch: {err}"

    gm = fused_matmul(xt.reshape(-1, 128), wt[:128, :], bt, at,
                      out_dtype=jnp.float32)
    rm = xt.reshape(-1, 128).astype(jnp.float32) @ wt[:128, :].astype(jnp.float32)
    rm = rm + bt
    rm = jnp.where(rm >= 0, rm, at * rm)
    errm = float(jnp.max(jnp.abs(gm - rm)))
    assert errm < 0.1, f"fused_matmul mismatch: {errm}"

    # -- full forward ------------------------------------------------------------
    fwd = jax.jit(cnn_encoder_sphere_forward, static_argnums=(2,))
    features, cnn_code = fwd(x, params, nef)
    jax.block_until_ready((features, cnn_code))

    assert features.shape == (N, nef, 14, 12), features.shape
    assert cnn_code.shape == (N, nef), cnn_code.shape
    assert bool(jnp.all(jnp.isfinite(features)))
    assert bool(jnp.all(jnp.isfinite(cnn_code)))
    print("KERNEL_OK")
</pallas_src>

<mosaic_0001>
module attributes {stable_mosaic.version = 11 : i64} {
  func.func @kernel(%arg0: i32, %arg1: i32, %arg2: memref<1x176x128xbf16, #tpu.memory_space<vmem>>, %arg3: memref<1152x128xbf16, #tpu.memory_space<vmem>>, %arg4: memref<1x128xf32, #tpu.memory_space<vmem>>, %arg5: memref<1x128xf32, #tpu.memory_space<vmem>>, %arg6: memref<1x8x8x128xbf16, #tpu.memory_space<vmem>>, %arg7: memref<1x8x8x128xbf16, #tpu.memory_space<vmem>>) attributes {dimension_semantics = [#tpu.dimension_semantics<parallel>, #tpu.dimension_semantics<parallel>], iteration_bounds = array<i64: 2, 1>, scalar_prefetch = 0 : i64, scratch_operands = 0 : i64, tpu.core_type = #tpu.core_type<tc>, window_params = [{transform_indices = @transform_0, window_bounds = array<i64: 1, 176, 128>}, {transform_indices = @transform_1, window_bounds = array<i64: 1152, 128>}, {transform_indices = @transform_2, window_bounds = array<i64: 1, 128>}, {transform_indices = @transform_3, window_bounds = array<i64: 1, 128>}, {transform_indices = @transform_4, window_bounds = array<i64: 1, 8, 8, 128>}, {transform_indices = @transform_5, window_bounds = array<i64: 1, 8, 8, 128>}]} {
    %c0 = arith.constant 0 : index
    %c0_0 = arith.constant 0 : index
    %c0_1 = arith.constant 0 : index
    %0 = vector.load %arg2[%c0, %c0_0, %c0_1] : memref<1x176x128xbf16, #tpu.memory_space<vmem>>, vector<1x128x128xbf16>
    %1 = vector.shape_cast %0 : vector<1x128x128xbf16> to vector<128x128xbf16>
    %c0_2 = arith.constant 0 : index
    %c1 = arith.constant 1 : index
    %c0_3 = arith.constant 0 : index
    %2 = vector.load %arg2[%c0_2, %c1, %c0_3] : memref<1x176x128xbf16, #tpu.memory_space<vmem>>, vector<1x128x128xbf16>
    %3 = vector.shape_cast %2 : vector<1x128x128xbf16> to vector<128x128xbf16>
    %c0_4 = arith.constant 0 : index
    %c2 = arith.constant 2 : index
    %c0_5 = arith.constant 0 : index
    %4 = vector.load %arg2[%c0_4, %c2, %c0_5] : memref<1x176x128xbf16, #tpu.memory_space<vmem>>, vector<1x128x128xbf16>
    %5 = vector.shape_cast %4 : vector<1x128x128xbf16> to vector<128x128xbf16>
    %c0_6 = arith.constant 0 : index
    %c16 = arith.constant 16 : index
    %c0_7 = arith.constant 0 : index
    %6 = vector.load %arg2[%c0_6, %c16, %c0_7] : memref<1x176x128xbf16, #tpu.memory_space<vmem>>, vector<1x128x128xbf16>
    %7 = vector.shape_cast %6 : vector<1x128x128xbf16> to vector<128x128xbf16>
    %c0_8 = arith.constant 0 : index
    %c17 = arith.constant 17 : index
    %c0_9 = arith.constant 0 : index
    %8 = vector.load %arg2[%c0_8, %c17, %c0_9] : memref<1x176x128xbf16, #tpu.memory_space<vmem>>, vector<1x128x128xbf16>
    %9 = vector.shape_cast %8 : vector<1x128x128xbf16> to vector<128x128xbf16>
    %c0_10 = arith.constant 0 : index
    %c18 = arith.constant 18 : index
    %c0_11 = arith.constant 0 : index
    %10 = vector.load %arg2[%c0_10, %c18, %c0_11] : memref<1x176x128xbf16, #tpu.memory_space<vmem>>, vector<1x128x128xbf16>
    %11 = vector.shape_cast %10 : vector<1x128x128xbf16> to vector<128x128xbf16>
    %c0_12 = arith.constant 0 : index
    %c32 = arith.constant 32 : index
    %c0_13 = arith.constant 0 : index
    %12 = vector.load %arg2[%c0_12, %c32, %c0_13] : memref<1x176x128xbf16, #tpu.memory_space<vmem>>, vector<1x128x128xbf16>
    %13 = vector.shape_cast %12 : vector<1x128x128xbf16> to vector<128x128xbf16>
    %c0_14 = arith.constant 0 : index
    %c33 = arith.constant 33 : index
    %c0_15 = arith.constant 0 : index
    %14 = vector.load %arg2[%c0_14, %c33, %c0_15] : memref<1x176x128xbf16, #tpu.memory_space<vmem>>, vector<1x128x128xbf16>
    %15 = vector.shape_cast %14 : vector<1x128x128xbf16> to vector<128x128xbf16>
    %c0_16 = arith.constant 0 : index
    %c34 = arith.constant 34 : index
    %c0_17 = arith.constant 0 : index
    %16 = vector.load %arg2[%c0_16, %c34, %c0_17] : memref<1x176x128xbf16, #tpu.memory_space<vmem>>, vector<1x128x128xbf16>
    %17 = vector.shape_cast %16 : vector<1x128x128xbf16> to vector<128x128xbf16>
    %18 = tpu.concatenate %1, %3, %5, %7, %9, %11, %13, %15, %17 in 1 : vector<128x128xbf16>, vector<128x128xbf16>, vector<128x128xbf16>, vector<128x128xbf16>, vector<128x128xbf16>, vector<128x128xbf16>, vector<128x128xbf16>, vector<128x128xbf16>, vector<128x128xbf16> -> vector<128x1152xbf16>
    %c0_18 = arith.constant 0 : index
    %c0_19 = arith.constant 0 : index
    %19 = vector.load %arg3[%c0_18, %c0_19] : memref<1152x128xbf16, #tpu.memory_space<vmem>>, vector<1152x128xbf16>
    %cst = arith.constant dense<0.000000e+00> : vector<128x128xf32>
    %20 = tpu.matmul %18, %19, %cst {dimension_numbers = #tpu.dot_dimension_numbers<[1], [0], [0], [1], [0, 0, 1, 1], [], []>} : vector<128x1152xbf16>, vector<1152x128xbf16>, vector<128x128xf32> -> vector<128x128xf32>
    %c0_20 = arith.constant 0 : index
    %c0_21 = arith.constant 0 : index
    %21 = vector.load %arg4[%c0_20, %c0_21] : memref<1x128xf32, #tpu.memory_space<vmem>>, vector<1x128xf32>
    %22 = vector.broadcast %21 : vector<1x128xf32> to vector<128x128xf32>
    %23 = arith.addf %20, %22 : vector<128x128xf32>
    %cst_22 = arith.constant 0.000000e+00 : f32
    %24 = vector.broadcast %cst_22 : f32 to vector<128x128xf32>
    %25 = arith.cmpf oge, %23, %24 : vector<128x128xf32>
    %c0_23 = arith.constant 0 : index
    %c0_24 = arith.constant 0 : index
    %26 = vector.load %arg5[%c0_23, %c0_24] : memref<1x128xf32, #tpu.memory_space<vmem>>, vector<1x128xf32>
    %27 = vector.broadcast %26 : vector<1x128xf32> to vector<128x128xf32>
    %28 = arith.mulf %27, %23 : vector<128x128xf32>
    %29 = arith.select %25, %23, %28 : vector<128x128xi1>, vector<128x128xf32>
    %30 = vector.shape_cast %29 : vector<128x128xf32> to vector<8x16x128xf32>
    %31 = vector.extract_strided_slice %30 {offsets = [0, 0, 0], sizes = [8, 8, 128], strides = [1, 1, 1]} : vector<8x16x128xf32> to vector<8x8x128xf32>
    %c0_25 = arith.constant 0 : index
    %c0_26 = arith.constant 0 : index
    %c0_27 = arith.constant 0 : index
    %c0_28 = arith.constant 0 : index
    %32 = vector.load %arg6[%c0_25, %c0_26, %c0_27, %c0_28] : memref<1x8x8x128xbf16, #tpu.memory_space<vmem>>, vector<1x8x8x128xbf16>
    %33 = vector.shape_cast %32 : vector<1x8x8x128xbf16> to vector<8x8x128xbf16>
    %34 = arith.extf %33 : vector<8x8x128xbf16> to vector<8x8x128xf32>
    %35 = arith.addf %31, %34 : vector<8x8x128xf32>
    %36 = arith.truncf %35 : vector<8x8x128xf32> to vector<8x8x128xbf16>
    %c0_29 = arith.constant 0 : index
    %c0_30 = arith.constant 0 : index
    %c0_31 = arith.constant 0 : index
    %c0_32 = arith.constant 0 : index
    %37 = vector.load %arg7[%c0_29, %c0_30, %c0_31, %c0_32] : memref<1x8x8x128xbf16, #tpu.memory_space<vmem>>, vector<1x8x8x128xbf16>
    %38 = vector.shape_cast %37 : vector<1x8x8x128xbf16> to vector<8x8x128xbf16>
    %39 = vector.shape_cast %36 : vector<8x8x128xbf16> to vector<1x8x8x128xbf16>
    tpu.vector_store %arg7[%c0_29, %c0_30, %c0_31, %c0_32], %39 {strides = array<i32>} : memref<1x8x8x128xbf16, #tpu.memory_space<vmem>>, vector<1x8x8x128xbf16>,
    return
  }
  func.func @transform_0(%arg0: i32, %arg1: i32) -> (i32, i32, i32) {
    %c0_i32 = arith.constant 0 : i32
    %c0_i32_0 = arith.constant 0 : i32
    %c0_i32_1 = arith.constant 0 : i32
    return %arg0, %c0_i32, %c0_i32_0 : i32, i32, i32
  }
  func.func @transform_1(%arg0: i32, %arg1: i32) -> (i32, i32) {
    %c0_i32 = arith.constant 0 : i32
    %c0_i32_0 = arith.constant 0 : i32
    return %c0_i32, %arg1 : i32, i32
  }
  func.func @transform_2(%arg0: i32, %arg1: i32) -> (i32, i32) {
    %c0_i32 = arith.constant 0 : i32
    %c0_i32_0 = arith.constant 0 : i32
    return %c0_i32, %arg1 : i32, i32
  }
  func.func @transform_3(%arg0: i32, %arg1: i32) -> (i32, i32) {
    %c0_i32 = arith.constant 0 : i32
    %c0_i32_0 = arith.constant 0 : i32
    return %c0_i32, %arg1 : i32, i32
  }
  func.func @transform_4(%arg0: i32, %arg1: i32) -> (i32, i32, i32, i32) {
    %c0_i32 = arith.constant 0 : i32
    %c0_i32_0 = arith.constant 0 : i32
    %c0_i32_1 = arith.constant 0 : i32
    return %arg0, %c0_i32, %c0_i32_0, %arg1 : i32, i32, i32, i32
  }
  func.func @transform_5(%arg0: i32, %arg1: i32) -> (i32, i32, i32, i32) {
    %c0_i32 = arith.constant 0 : i32
    %c0_i32_0 = arith.constant 0 : i32
    %c0_i32_1 = arith.constant 0 : i32
    return %arg0, %c0_i32, %c0_i32_0, %arg1 : i32, i32, i32, i32
  }
}

</mosaic_0001>

<bundles_post_ra>
// kernel: tpu_custom_call.1
= control target key start
LH: loop header
LB: loop body
LE: loop exit
PB: predicated region body
PF: predicated region fallthrough
CT: control target
= control target key end

     0   :  { %s3264_s0 = inlined_call_operand.hbm [shape: bf16[2,176,128], index: 0, kind: input, shape index: {}]   ;;  %s3265_s1 = inlined_call_operand.hbm [shape: bf16[1152,128], index: 1, kind: input, shape index: {}]   ;;  %s3266_s2 = inlined_call_operand.vmem [shape: f32[1,128], index: 2, kind: input, shape index: {}]   ;;  %s3267_s3 = inlined_call_operand.vmem [shape: f32[1,128], index: 3, kind: input, shape index: {}]   ;;  %s3268_s4 = inlined_call_operand.hbm [shape: bf16[2,8,8,128], index: 4, kind: input, shape index: {}]   ;;  %s3269_s5 = inlined_call_operand.hbm [shape: bf16[2,8,8,128], index: 5, kind: output, shape index: {}]  }
   0x1   :  { %3279 = sst [smem:[#allocation14_spill]] %s3264_s0 }
   0x2   :  { %3280 = sst [smem:[#allocation15_spill]] %s3268_s4 }
   0x3   :  { %10 = vsyncpa [#allocation3], 0 }
   0x4   :  { %12 = vsyncpa [#allocation3 + $0x1], 0 }
   0x5   :  { %13 = vsyncpa [#allocation6], 0 }
   0x6   :  { %14 = vsyncpa [#allocation4], 0 }
   0x7   :  { %16 = vsyncpa [#allocation4 + $0x1], 0  ;;  %s2723_s18 = smov 0   ;;  %s2725_s19 = smov 0  }
   0x8   :  { %s2727_s20 = smov 0   ;;  %s2729_s21 = smov 0  }
   0x9   :  { %s2731_s22 = smov 0   ;;  %s2733_s23 = smov 0  }
   0xa LB: > { %s34_s24 = sadd.s32 1, %s2679_s22  ;;  %s41_s25 = sadd.s32 1, %s2671_s20  ;;  %s2683_s23 = sphi %s2733_s23, %s22_s23   ;;  %s2679_s22 = sphi %s2731_s22, %s3304_s22   ;;  %s2675_s21 = sphi %s2729_s21, %s3303_s21   ;;  %s2671_s20 = sphi %s2727_s20, %s3302_s20   ;;  %s2667_s19 = sphi %s2725_s19, %s3301_s19   ;;  %s2663_s18 = sphi %s2723_s18, %s3300_s18  }
   0xb   : > { %p36_p0 = scmp.ge.s32.totalorder %s34_s24, 2  ;;  %p48_p1 = scmp.ne.s32.totalorder %s2671_s20, %s2667_s19 }
   0xc   : > { %p49_p2 = scmp.eq.s32.totalorder %s2683_s23, 0  ;;  %p2361_p6 = scmp.lt.s32.totalorder %s2683_s23, 2 }
   0xd   : > { %s3306_s24 = smov (%p36_p0, %s34_s24), 0  ;;  %s239_s27 = sand.u32 1, %s2683_s23  }
   0xe   : > { %3281 = sst [smem:[#allocation13_spill]] %s3306_s24  ;;  %p50_p3 = por %p49_p2, %p48_p1 }
   0xf   : > { %s38_s26 = ssub.s32 %s2679_s22, %s3306_s24  ;;  %s241_s28 = sand.u32 1, %s2671_s20  }
  0x10   : > { %p39_p5 = scmp.eq.s32.totalorder %s38_s26, 0  ;;  %s2332_s30 = smul.u32 88, %s241_s28 }
  0x11   : > { %s2333_s6 = smul.u32 1408, %s2679_s22  ;;  %p2773_p7 = pnand %p2361_p6, %p50_p3 }
  0x12   : > { %s2770_s29 = scalar_select %p39_p5, %s2671_s20, %s41_s25  }
  0x13   : > { %s2777_s8 = sshll.u32 %s241_s28, 5  ;;  %s3283_s0 = sld [smem:[#allocation14_spill]] }
  0x14   : > { %s243_s12 = scalar_lea.vmem [#allocation2], %s2332_s30  ;;  %s2786_s14 = scalar_lea.sflag [#allocation3], %s239_s27 }
  0x15   : > { %s250_s13 = sshll.u32 %s243_s12, 4  ;;  %p2507_p9 = pneg %p2773_p7  ;;  %s2784_s13 = int_to_ptr.vmem [resolvable:$true] %s250_s13 }
  0x19   : > { %s2782_s11 = scalar_lea.hbm %s3283_s0, %s2333_s6  ;;  %s2510_s25 = scalar_lea.hbm %s3283_s0, 2816 }
  0x1a   : > { %s2505_s15 = scalar_lea.hbm %s2782_s11, 1408  ;;  %p2511_p12 = scmp.lt.u32.totalorder %s2782_s11, %s3283_s0 }
  0x1b   : > { %p2506_p8 = scmp.ne.s32.totalorder %s2782_s11, %s2505_s15  ;;  %p2512_p13 = scmp.lt.u32.totalorder %s2510_s25, %s2505_s15 }
  0x1c   : > { %p2514_p2 = scmp.lt.u32.totalorder %s2505_s15, %s2782_s11 }
  0x1d   : > { %p2508_p10 = pnand %p2507_p9, %p2506_p8  ;;  %p2513_p0 = por %p2512_p13, %p2511_p12 }
  0x1f   : > { %p2509_p11 = pneg %p2508_p10  ;;  %p2515_p3 = por %p2514_p2, %p2513_p0 }
  0x21   : > { %p2516_p5 = pnand %p2515_p3, %p2509_p11 }
  0x23   : > { %2519 = shalt.err (!%p2516_p5)
}
  0x24   : > { %s2520_s27 = scalar_lea.vmem %s2784_s13, 1408  ;;  %s2685_s30 = smov [#allocation2]  }
  0x25   : > { %p2521_p6 = scmp.ne.s32.totalorder %s2784_s13, %s2520_s27  ;;  %s2525_s6 = sshll.u32 %s2685_s30, 4  ;;  %s2526_s6 = int_to_ptr.vmem [resolvable:$false] %s2525_s6 }
  0x26   : > { %s2527_s9 = scalar_lea.vmem %s2526_s6, 2816  ;;  %p2528_p4 = scmp.lt.s32.totalorder %s2784_s13, %s2526_s6 }
  0x27   : > { %p2523_p8 = pnand %p2521_p6, %p2507_p9  ;;  %p2529_p12 = scmp.lt.s32.totalorder %s2527_s9, %s2520_s27 }
  0x29   : > { %p2524_p10 = pneg %p2523_p8  ;;  %p2530_p13 = por %p2529_p12, %p2528_p4 }
  0x2b   : > { %p2531_p0 = pnand %p2530_p13, %p2524_p10 }
  0x2d   : > { %2534 = shalt.err (!%p2531_p0)
}
  0x2e   : > { %s3270_s10 = smov 64   ;;  %s3272_s12 = smov 4  }
  0x2f   : > { %2352 = dma.hbm_to_vmem [thread:$0]  (!%p2773_p7), %s2782_s11, 1408, %s2784_s13, %s2786_s14, %s3270_s10, %s3270_s10, %s3272_s12  }
  0x30   : > { %s2818_s15 = sadd.s32 4294967295, %s2683_s23   ;;  %s1859_s16 = sadd.s32 4294967294, %s2683_s23  }
  0x31   : > { %p54_p4 = scmp.ne.s32.totalorder %s2667_s19, %s2663_s18  ;;  %p3274_p11 = scmp.eq.s32.totalorder %s2818_s15, 0 }
  0x32   : > { %p186_p2 = scmp.eq.s32.totalorder %s2818_s15, 1  ;;  %p192_p3 = scmp.eq.s32.totalorder %s1859_s16, 1 }
  0x33   : > { %p1860_p5 = scmp.ge.s32.totalorder %s2683_s23, 1  ;;  %p2828_p6 = por %p3274_p11, %p54_p4 }
  0x34   : > { %p2835_p8 = por %p186_p2, %p48_p1  ;;  %p2839_p10 = por %p192_p3, %p54_p4 }
  0x35   : > { %s3284_s17 = scalar_select %p2828_p6, 1, 0 }
  0x36   : > { %s3285_s11 = scalar_select %p2835_p8, 1, 0 }
  0x37   : > { %s3286_s13 = scalar_select %p2839_p10, 1, 0 }
  0x38   : > { %p199_p12 = scmp.lt.s32.totalorder %s2683_s23, 3  ;;  %s2688_s26 = smov [#allocation5]  }
  0x39   : > { %s213_s28 = sshll.u32 %s2688_s26, 4  ;;  %s1968_s27 = sshll.u32 %s2679_s22, 9  ;;  %s2856_s28 = int_to_ptr.vmem [resolvable:$true] %s213_s28 }
  0x3a   : > { %p2844_p13 = pnand %p1860_p5, %p199_p12  ;;  %s3288_s4 = sld [smem:[#allocation15_spill]] }
  0x3b   : > { %s264_s16 = scalar_lea.vmem [#allocation7], %s2777_s8 }
  0x3c   : > { %s3287_s25 = scalar_select %p2844_p13, 1, 0 }
  0x3d   : > { %p2345_p0 = pneg %p2844_p13  ;;  %s272_s10 = sshll.u32 %s264_s16, 4  ;;  %s2865_s10 = int_to_ptr.vmem [resolvable:$true] %s272_s10 }
  0x3f   : > { %p2861_p1 = pnand %p2345_p0, %p3274_p11 }
  0x40   : > { %s2854_s9 = scalar_lea.hbm %s3288_s4, %s1968_s27  ;;  %s2540_s6 = scalar_lea.hbm %s3288_s4, 1024 }
  0x41   : > { %s2535_s26 = scalar_lea.hbm %s2854_s9, 512  ;;  %p2541_p5 = scmp.lt.u32.totalorder %s2854_s9, %s3288_s4 }
  0x42   : > { %p2536_p4 = scmp.ne.s32.totalorder %s2854_s9, %s2535_s26  ;;  %p2542_p12 = scmp.lt.u32.totalorder %s2540_s6, %s2535_s26 }
  0x43   : > { %p2544_p11 = scmp.lt.u32.totalorder %s2535_s26, %s2854_s9 }
  0x44   : > { %p2538_p2 = pnand %p2536_p4, %p2507_p9  ;;  %p2543_p0 = por %p2542_p12, %p2541_p5 }
  0x46   : > { %p2539_p3 = pneg %p2538_p2  ;;  %p2545_p10 = por %p2544_p11, %p2543_p0 }
  0x48   : > { %p2546_p8 = pnand %p2545_p10, %p2539_p3 }
  0x4a   : > { %2549 = shalt.err (!%p2546_p8)
}
  0x4b   : > { %s2550_s16 = scalar_lea.vmem %s2865_s10, 512  ;;  %s2689_s27 = smov [#allocation7]  }
  0x4c   : > { %p2551_p4 = scmp.ne.s32.totalorder %s2865_s10, %s2550_s16  ;;  %s2555_s30 = sshll.u32 %s2689_s27, 4  ;;  %s2556_s30 = int_to_ptr.vmem [resolvable:$false] %s2555_s30 }
  0x4d   : > { %s2557_s0 = scalar_lea.vmem %s2556_s30, 1024  ;;  %p2558_p13 = scmp.lt.s32.totalorder %s2865_s10, %s2556_s30 }
  0x4e   : > { %p2553_p2 = pnand %p2551_p4, %p2507_p9  ;;  %p2559_p5 = scmp.lt.s32.totalorder %s2557_s0, %s2550_s16 }
  0x50   : > { %p2554_p6 = pneg %p2553_p2  ;;  %p2560_p12 = por %p2559_p5, %p2558_p13 }
  0x52   : > { %p2561_p11 = pnand %p2560_p12, %p2554_p6 }
  0x54   : > { %2564 = shalt.err (!%p2561_p11)
}
  0x55   : > { %s3290_s26 = smov 4   ;;  %s3291_s6 = smov 64  }
  0x56   : > { %2355 = dma.hbm_to_vmem [thread:$0]  (!%p2773_p7), %s2854_s9, 512, %s2865_s10, %s2786_s14, %s3291_s6, %s3291_s6, %s3290_s26  }
  0x57   : > { %s2565_s27 = scalar_lea.hbm %s3265_s1, 9216  ;;  %p2567_p6 = pneg %p2861_p1 }
  0x58   : > { %p2566_p9 = scmp.ne.s32.totalorder %s3265_s1, %s2565_s27  ;;  %p2572_p13 = scmp.lt.u32.totalorder %s2565_s27, %s3265_s1 }
  0x5a   : > { %p2568_p8 = pnand %p2567_p6, %p2566_p9 }
  0x5c   : > { %p2569_p10 = pneg %p2568_p8 }
  0x5e   : > { %p2574_p3 = pnand %p2572_p13, %p2569_p10 }
  0x60   : > { %2577 = shalt.err (!%p2574_p3)
}
  0x61   : > { %s2578_s14 = scalar_lea.vmem %s2856_s28, 9216  ;;  %p2586_p2 = scmp.lt.s32.totalorder %s2856_s28, %s2856_s28 }
  0x62   : > { %p2579_p7 = scmp.ne.s32.totalorder %s2856_s28, %s2578_s14  ;;  %p2587_p5 = scmp.lt.s32.totalorder %s2578_s14, %s2578_s14 }
  0x64   : > { %p2581_p0 = pnand %p2579_p7, %p2567_p6  ;;  %p2588_p12 = por %p2587_p5, %p2586_p2 }
  0x66   : > { %p2582_p4 = pneg %p2581_p0 }
  0x68   : > { %p2589_p11 = pnand %p2588_p12, %p2582_p4 }
  0x6a   : > { %2592 = shalt.err (!%p2589_p11)
}
  0x6b   : > { %2348 = dma.hbm_to_vmem [thread:$0]  (!%p2861_p1), %s3265_s1, 9216, %s2856_s28, [#allocation6], %s3291_s6, %s3291_s6, %s3290_s26  }
  0x6c   : > { %p3292_p9 = scmp.ne.s32.totalorder %s3287_s25, 0 }
  0x6d   : > { %s286_s10 = sand.u32 (!%p3292_p9), 1, %s2818_s15   ;;  %s2922_s9 = sand.u32 (!%p3292_p9), 1, %s2667_s19  }
  0x6e   : > { %284 = sbr.rel (%p3292_p9) target bundleno = 532 (0x214), region = 40  ;;  %s287_s12 = scalar_lea.sflag (!%p3292_p9), [#allocation3], %s286_s10 }
  0x6f   : > { %s2334_s0 = smul.u32 (!%p3292_p9), 88, %s2922_s9  ;;  %p3293_p6 = scmp.ne.s32.totalorder (!%p3292_p9), %s3284_s17, 0 }
  0x71   : > { %s2925_s8 = scalar_lea.vmem (!%p3292_p9), [#allocation2], %s2334_s0 }
  0x75   : > { %2646 = dma.done.wait (%p3293_p6), %s287_s12, 1408  }
  0x76   : > { %2648 = vsyncadd (%p3293_p6), %s287_s12, 4294965888  ;;  %p3294_p1 = scmp.eq.s32.totalorder %s2818_s15, 0 }
  0x78   : > { %2650 = dma.done.wait (%p3294_p1), [#allocation6], 9216   ;;  %p3295_p8 = pmov %p3294_p1 }
  0x79   : > { %s1871_s25 = sshll.u32 %s2922_s9, 5 }
  0x7a   : > { %2652 = vsyncadd (%p3295_p8), [#allocation6], 4294958080  ;;  %s2938_s28 = scalar_lea.vmem [#allocation7], %s1871_s25 }
  0x7b   : > { %2654 = dma.done.wait (%p3293_p6), %s287_s12, 512  }
  0x7c   : > { %2656 = vsyncadd (%p3293_p6), %s287_s12, 4294966784  ;;  %v2417_v0 = vld [vmem:[#allocation5 + $0x40] sm:$0xff]   ;;  %v2421_v4 = vld [vmem:[#allocation5 + $0x48] sm:$0xff]   ;;  %vm425_vm0 = vsmask.f32 7424  ;;  %vm505_vm1 = vcmask 1046528  }
  0x7d   : > { %v2418_v1 = vld [vmem:[#allocation5 + $0xc0] sm:$0xff]   ;;  %2012 = vmatprep.subr.bf16.mxu0 %v2417_v0  ;;  %v2422_v5 = vld [vmem:[#allocation5 + $0xc8] sm:$0xff]   ;;  %v2425_v8 = vld [vmem:[#allocation5 + $0x50] sm:$0xff]   ;;  %s3195_s27 = scalar_lea.vmem [#allocation8], %s1871_s25  ;;  %s1969_s30 = sshll.u32 %s2675_s21, 9 }
  0x7e   : > { %v2419_v2 = vld [vmem:[#allocation5] sm:$0xff]   ;;  %2076 = vmatprep.subr.bf16.mxu1 %v2418_v1  ;;  %v2423_v6 = vld [vmem:[#allocation5 + $0x8] sm:$0xff]   ;;  %v2426_v9 = vld [vmem:[#allocation5 + $0xd0] sm:$0xff]   ;;  %s1717_s7 = sshll.u32 %s3195_s27, 4  ;;  %s3212_s4 = scalar_lea.hbm %s3269_s5, %s1969_s30  ;;  %s3214_s7 = int_to_ptr.vmem [resolvable:$true] %s1717_s7 }
  0x7f   : > { %v2420_v3 = vld [vmem:[#allocation5 + $0x80] sm:$0xff]   ;;  %2013 = vmatpush3.bf16.msra.mxu0 %v2419_v2  ;;  %v2424_v7 = vld [vmem:[#allocation5 + $0x88] sm:$0xff]   ;;  %v2427_v10 = vld [vmem:[#allocation5 + $0x10] sm:$0xff]   ;;  %s1703_s24 = scalar_lea.sflag [#allocation4], %s2922_s9  ;;  %s2593_s10 = scalar_lea.vmem %s3214_s7, 512 }
  0x80   : > { %2077 = vmatpush3.bf16.msra.mxu1 %v2420_v3  ;;  %2014 = vmatprep.subr.bf16.mxu0 %v2421_v4  ;;  %v2428_v11 = vld [vmem:[#allocation5 + $0x90] sm:$0xff]   ;;  %v2429_v12 = vld [vmem:[#allocation5 + $0x58] sm:$0xff]   ;;  %v2433_v16 = vld [vmem:[#allocation5 + $0x60] sm:$0xff]   ;;  %p2594_p10 = scmp.ne.s32.totalorder %s3214_s7, %s2593_s10  ;;  %p3296_p13 = scmp.ne.s32.totalorder %s3285_s11, 0 }
  0x81   : > { %2078 = vmatprep.subr.bf16.mxu1 %v2422_v5  ;;  %v2430_v13 = vld [vmem:[#allocation5 + $0xd8] sm:$0xff]   ;;  %v2434_v17 = vld [vmem:[#allocation5 + $0xe0] sm:$0xff]   ;;  %v2437_v20 = vld [vmem:[#allocation5 + $0x68] sm:$0xff]   ;;  %s2690_s21 = smov [#allocation8]  }
  0x82   : > { %v2431_v14 = vld [vmem:[#allocation5 + $0x18] sm:$0xff]   ;;  %v2435_v18 = vld [vmem:[#allocation5 + $0x20] sm:$0xff]   ;;  %v2438_v21 = vld [vmem:[#allocation5 + $0xe8] sm:$0xff]   ;;  %p2595_p3 = pnand %p2594_p10, %p3296_p13  ;;  %s2597_s0 = sshll.u32 %s2690_s21, 4  ;;  %s2598_s0 = int_to_ptr.vmem [resolvable:$false] %s2597_s0 }
  0x83   : > { %2015 = vmatpush3.bf16.msra.mxu0 %v2423_v6  ;;  %v2432_v15 = vld [vmem:[#allocation5 + $0x98] sm:$0xff]   ;;  %v2436_v19 = vld [vmem:[#allocation5 + $0xa0] sm:$0xff]   ;;  %v2439_v22 = vld [vmem:[#allocation5 + $0x28] sm:$0xff]   ;;  %s2599_s12 = scalar_lea.vmem %s2598_s0, 1024  ;;  %p2600_p0 = scmp.lt.s32.totalorder %s3214_s7, %s2598_s0 }
  0x84   : > { %2079 = vmatpush3.bf16.msra.mxu1 %v2424_v7  ;;  %2016 = vmatprep.subr.bf16.mxu0 %v2425_v8  ;;  %v2440_v23 = vld [vmem:[#allocation5 + $0xa8] sm:$0xff]   ;;  %v2441_v24 = vld [vmem:[#allocation5 + $0x70] sm:$0xff]   ;;  %v2445_v28 = vld [vmem:[#allocation5 + $0x78] sm:$0xff]   ;;  %p2596_p7 = pneg %p2595_p3  ;;  %p2601_p4 = scmp.lt.s32.totalorder %s2599_s12, %s2593_s10 }
  0x85   : > { %2080 = vmatprep.subr.bf16.mxu1 %v2426_v9  ;;  %v2442_v25 = vld [vmem:[#allocation5 + $0xf0] sm:$0xff]   ;;  %v2446_v29 = vld [vmem:[#allocation5 + $0xf8] sm:$0xff]   ;;  %v2452_v40 = vld [vmem:[#allocation5 + $0x140] sm:$0xff]  }
  0x86   : > { %v2443_v26 = vld [vmem:[#allocation5 + $0x30] sm:$0xff]   ;;  %v2447_v30 = vld [vmem:[#allocation5 + $0x38] sm:$0xff]   ;;  %v2453_v43 = vld [vmem:[#allocation5 + $0x1c0] sm:$0xff]   ;;  %p2602_p2 = por %p2601_p4, %p2600_p0 }
  0x87   : > { %2017 = vmatpush3.bf16.msra.mxu0 %v2427_v10  ;;  %v2444_v27 = vld [vmem:[#allocation5 + $0xb0] sm:$0xff]   ;;  %v2448_v31 = vld [vmem:[#allocation5 + $0xb8] sm:$0xff]   ;;  %v2455_v47 = vld [vmem:[#allocation5 + $0x180] sm:$0xff]  }
  0x88   : > { %2081 = vmatpush3.bf16.msra.mxu1 %v2428_v11  ;;  %2018 = vmatprep.subr.bf16.mxu0 %v2429_v12  ;;  %v348_v32 = vld [vmem:[%s2925_s8] sm:$0xf]  ;;  %v349_v33 = vld [vmem:[%s2925_s8 + $0x4] sm:$0xf]  ;;  %v350_v34 = vld [vmem:[%s2925_s8 + $0x8] sm:$0xf]  ;;  %p2603_p5 = pnand %p2602_p2, %p2596_p7 }
  0x89   : > { %2082 = vmatprep.subr.bf16.mxu1 %v2430_v13  ;;  %v2948_v35 = vld [vmem:[%s2925_s8 + $0xc] sm:$0xf]  ;;  %v1873_v36 = vcombine.low %v348_v32, %v349_v33  ;;  %v365_v37 = vld [vmem:[%s2925_s8] sm:$0xe]  ;;  %v2454_v51 = vld [vmem:[#allocation5 + $0x100] sm:$0xff]  }
  0x8a   : > { %v2952_v38 = vcombine.low %v350_v34, %v2948_v35  ;;  %v1882_v39 = vcombine.low %v365_v37, %v349_v33  ;;  %v352_v52 = vld [vmem:[%s2925_s8 + $0x10] sm:$0xf]  ;;  %v2961_v55 = vld [vmem:[%s2925_s8 + $0x14] sm:$0xf]  ;;  %v2458_v57 = vld [vmem:[#allocation5 + $0x1c8] sm:$0xff]  }
  0x8b   : > { %2019 = vmatpush3.bf16.msra.mxu0 %v2431_v14  ;;  %v427_v41 = vshrl.u32 %v1873_v36, 16  ;;  %v429_v42 = vshll.u32 %v1873_v36, 16  ;;  %v2964_v56 = vcombine.low %v352_v52, %v2961_v55  ;;  %v2457_v59 = vld [vmem:[#allocation5 + $0x148] sm:$0xff]   ;;  %v2462_v5 = vld [vmem:[#allocation5 + $0x150] sm:$0xff]   ;;  %v2475_v33 = vld [vmem:[#allocation5 + $0x1a0] sm:$0xff]  }
  0x8c   : > { %2083 = vmatpush3.bf16.msra.mxu1 %v2432_v15  ;;  %2020 = vmatprep.subr.bf16.mxu0 %v2433_v16  ;;  %v434_v44 = vshll.u32 %v2952_v38, 16  ;;  %v506_v45 = vrot.slane %v1882_v39, 1  ;;  %v507_v46 = vrot.slane %v2952_v38, 1  ;;  %v438_v53 = vshrl.u32 %v2952_v38, 16  ;;  %v2459_v63 = vld [vmem:[#allocation5 + $0x108] sm:$0xff]   ;;  %v2463_v10 = vld [vmem:[#allocation5 + $0x1d0] sm:$0xff]  }
  0x8d   : > { %2084 = vmatprep.subr.bf16.mxu1 %v2434_v17  ;;  %1307 = vmatprep.mubr.bf16.mxu1 %v2952_v38  ;;  %v431_v48 = vrot.slane %v429_v42, 1  ;;  %v442_v61 = vshll.u32 %v2964_v56, 16  ;;  %v2970_v62 = vrot.slane %v2964_v56, 1  ;;  %v2460_v0 = vld [vmem:[#allocation5 + $0x188] sm:$0xff]   ;;  %v446_v1 = vshrl.u32 %v2964_v56, 16  ;;  %v2464_v11 = vld [vmem:[#allocation5 + $0x110] sm:$0xff]  }
  0x8e   : > { %v436_v49 = vrot.slane %v434_v44, 1  ;;  %v508_v50 = vsel %vm505_vm1, %v506_v45, %v507_v46  ;;  %v2976_v4 = vld [vmem:[%s2925_s8 + $0x18] sm:$0xff]   ;;  %v2465_v13 = vld [vmem:[#allocation5 + $0x190] sm:$0xff]   ;;  %v2467_v17 = vld [vmem:[#allocation5 + $0x158] sm:$0xff]  }
  0x8f   : > { %2021 = vmatpush3.bf16.msra.mxu0 %v2435_v18  ;;  %v432_v54 = vor.u32 %v431_v48, %v427_v41  ;;  %v444_v2 = vrot.slane %v442_v61, 1  ;;  %v510_v3 = vsel %vm505_vm1, %v507_v46, %v2970_v62  ;;  %v450_v8 = vshll.u32 %v2976_v4, 16  ;;  %v2988_v14 = vld [vmem:[%s2925_s8 + $0x20] sm:$0xff]   ;;  %v3015_v34 = vld [vmem:[%s2925_s8 + $0x30] sm:$0xff]  }
  0x90   : > { %2085 = vmatpush3.bf16.msra.mxu1 %v2436_v19  ;;  %2022 = vmatprep.subr.bf16.mxu0 %v2437_v20  ;;  %v440_v60 = vor.u32 %v438_v53, %v436_v49  ;;  %v2983_v9 = vrot.slane %v2976_v4, 1  ;;  %v454_v15 = vshrl.u32 %v2976_v4, 16  ;;  %v458_v18 = vshll.u32 %v2988_v14, 16  ;;  %v2468_v19 = vld [vmem:[#allocation5 + $0x1d8] sm:$0xff]   ;;  %v2477_v37 = vld [vmem:[#allocation5 + $0x168] sm:$0xff]   ;;  %v2483_v48 = vld [vmem:[#allocation5 + $0x1f0] sm:$0xff]  }
  0x91   : > { %2086 = vmatprep.subr.bf16.mxu1 %v2438_v21  ;;  %v437_v58 = vsel %vm425_vm0, %v432_v54, %v436_v49  ;;  %v448_v7 = vor.u32 %v446_v1, %v444_v2  ;;  %v452_v12 = vrot.slane %v450_v8, 1  ;;  %v2469_v20 = vld [vmem:[#allocation5 + $0x118] sm:$0xff]   ;;  %v2479_v41 = vld [vmem:[#allocation5 + $0x128] sm:$0xff]   ;;  %v474_v46 = vshll.u32 %v3015_v34, 16  ;;  %v2484_v49 = vld [vmem:[#allocation5 + $0x130] sm:$0xff]  }
  0x92   : > { %1218 = vmatprep.mubr.bf16.mxu0 %v437_v58  ;;  %v2979_v6 = vsel %vm425_vm0, %v440_v60, %v444_v2  ;;  %v3000_v21 = vsel %vm505_vm1, %v2970_v62, %v2983_v9  ;;  %v2480_v42 = vld [vmem:[#allocation5 + $0x1a8] sm:$0xff]   ;;  %v517_v58 = vrot.slane %v3015_v34, 1  ;;  %v2489_v60 = vld [vmem:[#allocation5 + $0x1f8] sm:$0xff]  }
  0x93   : > { %2023 = vmatpush3.bf16.msra.mxu0 %v2439_v22  ;;  %v2992_v16 = vsel %vm425_vm0, %v448_v7, %v452_v12  ;;  %v456_v22 = vor.u32 %v454_v15, %v452_v12  ;;  %v476_v53 = vrot.slane %v474_v46, 1  ;;  %v3036_v54 = vld [vmem:[%s2925_s8 + $0x38] sm:$0xff]   ;;  %v2491_v1 = vld [vmem:[#allocation5 + $0x1b8] sm:$0xff]   ;;  %v2486_v2 = vld [vmem:[%s2925_s8 + $0x40] ss:$0 sps:$4 sm:$0x11]  }
  0x94   : > { %2087 = vmatpush3.bf16.msra.mxu1 %v2440_v23  ;;  %2024 = vmatprep.subr.bf16.mxu0 %v2441_v24  ;;  %v460_v23 = vrot.slane %v458_v18, 1  ;;  %v2470_v24 = vld [vmem:[#allocation5 + $0x198] sm:$0xff]   ;;  %v486_v12 = vshrl.u32 %v3036_v54, 16 }
  0x95   : > { %2088 = vmatprep.subr.bf16.mxu1 %v2442_v25  ;;  %v3003_v25 = vld [vmem:[%s2925_s8 + $0x28] sm:$0xff]  }
  0x96   : > { %v3011_v32 = vsel %vm425_vm0, %v456_v22, %v460_v23  ;;  %v470_v44 = vshrl.u32 %v3003_v25, 16  ;;  %v373_v22 = vld [vmem:[%s2925_s8 + $0x10] sm:$0xe] }
  0x97   : > { %2025 = vmatpush3.bf16.msra.mxu0 %v2443_v26  ;;  %v513_v26 = vrot.slane %v2988_v14, 1 }
  0x98   : > { %2089 = vmatpush3.bf16.msra.mxu1 %v2444_v27  ;;  %2026 = vmatprep.subr.bf16.mxu0 %v2445_v28  ;;  %v2472_v27 = vld [vmem:[#allocation5 + $0x160] sm:$0xff]   ;;  %v462_v28 = vshrl.u32 %v2988_v14, 16 }
  0x99   : > { %2090 = vmatprep.subr.bf16.mxu1 %v2446_v29  ;;  %v466_v29 = vshll.u32 %v3003_v25, 16 }
  0x9b   : > { %2027 = vmatpush3.bf16.msra.mxu0 %v2447_v30  ;;  %v2473_v30 = vld [vmem:[#allocation5 + $0x1e0] sm:$0xff]   ;;  %v468_v39 = vrot.slane %v466_v29, 1 }
  0x9c   : > { %2091 = vmatpush3.bf16.msra.mxu1 %v2448_v31  ;;  %2140 = vmatprep.subr.bf16.mxu0 %v2452_v40  ;;  %v2474_v31 = vld [vmem:[#allocation5 + $0x120] sm:$0xff]   ;;  %v2478_v40 = vld [vmem:[#allocation5 + $0x1e8] sm:$0xff]  }
  0x9d   : > { %2204 = vmatprep.subr.bf16.mxu1 %v2453_v43  ;;  %v515_v43 = vrot.slane %v3003_v25, 1  ;;  %v472_v52 = vor.u32 %v470_v44, %v468_v39 }
  0x9e   : > { %1219 = vmatmul.mubr.bf16.vlgmr.msra.gmra.mrb[0].mxu0 %v1873_v36  ;;  %v3020_v36 = vsel %vm505_vm1, %v2983_v9, %v513_v26 }
  0x9f   : > { %1308 = vmatmul.mubr.bf16.vlgmr.msra.gmra.mrb[0].mxu1 %v508_v50  ;;  %2141 = vmatpush3.bf16.msra.mxu0 %v2454_v51  ;;  %v3033_v50 = vsel %vm505_vm1, %v513_v26, %v515_v43  ;;  %v2485_v51 = vld [vmem:[#allocation5 + $0x1b0] sm:$0xff]   ;;  %v3043_v61 = vsel %vm425_vm0, %v472_v52, %v476_v53 }
  0xa0   : > { %2205 = vmatpush3.bf16.msra.mxu1 %v2455_v47  ;;  %1314 = vmatprep.mubr.bf16.mxu1 %v2964_v56  ;;  %v2482_v47 = vld [vmem:[#allocation5 + $0x170] sm:$0xff]  }
  0xa1   : > { %2206 = vmatprep.subr.bf16.mxu1 %v2458_v57  ;;  %2142 = vmatprep.subr.bf16.mxu0 %v2457_v59  ;;  %v2488_v57 = vld [vmem:[#allocation5 + $0x178] sm:$0xff]   ;;  %v478_v59 = vshrl.u32 %v3015_v34, 16 }
  0xa2   : > { %1225 = vmatprep.mubr.bf16.mxu0 %v2979_v6 }
  0xa3   : > { %2143 = vmatpush3.bf16.msra.mxu0 %v2459_v63  ;;  %v482_v63 = vshll.u32 %v3036_v54, 16  ;;  %v480_v7 = vor.u32 %v478_v59, %v476_v53 }
  0xa4   : > { %2207 = vmatpush3.bf16.msra.mxu1 %v2460_v0  ;;  %2144 = vmatprep.subr.bf16.mxu0 %v2462_v5  ;;  %v2490_v0 = vld [vmem:[#allocation5 + $0x138] sm:$0xff]   ;;  %v3050_v5 = vsel %vm505_vm1, %v515_v43, %v517_v58 }
  0xa5   : > { %2208 = vmatprep.subr.bf16.mxu1 %v2463_v10  ;;  %v484_v8 = vrot.slane %v482_v63, 1  ;;  %v3055_v10 = vrot.slane %v3036_v54, 1 }
  0xa6   : > { %1226 = vmatmul.mubr.bf16.gmra.mrb[4].mxu0 %v2952_v38  ;;  %v464_v38 = vor.u32 %v462_v28, %v460_v23  ;;  %v521_v23 = vrot.slane %v2486_v2, 1 }
  0xa7   : > { %1315 = vmatmul.mubr.bf16.gmra.mrb[4].mxu1 %v510_v3  ;;  %1232 = vmatprep.mubr.bf16.mxu0 %v2992_v16  ;;  %v2493_v3 = vld [vmem:[#allocation5 + $0x200] sm:$0xff]   ;;  %v3065_v15 = vsel %vm505_vm1, %v517_v58, %v3055_v10  ;;  %v3070_v18 = vor.u32 %v486_v12, %v484_v8 }
  0xa8   : > { %1321 = vmatprep.mubr.bf16.mxu1 %v2976_v4  ;;  %2209 = vmatpush3.bf16.msra.mxu1 %v2465_v13  ;;  %v3027_v45 = vsel %vm425_vm0, %v464_v38, %v468_v39  ;;  %v490_v13 = vshll.u32 %v2486_v2, 16  ;;  %v522_v29 = vsel %vm505_vm1, %v3055_v10, %v521_v23 }
  0xa9   : > { %2145 = vmatpush3.bf16.msra.mxu0 %v2464_v11  ;;  %2210 = vmatprep.subr.bf16.mxu1 %v2468_v19  ;;  %v3058_v11 = vsel %vm425_vm0, %v480_v7, %v484_v8  ;;  %v3137_v7 = vld [vmem:[%s3266_s2] ss:$0 sm:$0xff] }
  0xaa   : > { %2146 = vmatprep.subr.bf16.mxu0 %v2467_v17  ;;  %v3068_v17 = vld [vmem:[%s2925_s8 + $0x40] sm:$0xff]   ;;  %v492_v19 = vrot.slane %v490_v13, 1 }
  0xac   : > { %2211 = vmatpush3.bf16.msra.mxu1 %v2470_v24  ;;  %v1888_v24 = vcombine.low %v373_v22, %v2961_v55  ;;  %v493_v26 = vsel %vm425_vm0, %v3070_v18, %v492_v19 }
  0xad   : > { %2147 = vmatpush3.bf16.msra.mxu0 %v2469_v20  ;;  %2212 = vmatprep.subr.bf16.mxu1 %v2473_v30  ;;  %v369_v20 = vld [vmem:[%s2925_s8 + $0x8] sm:$0xe] }
  0xae   : > { %2148 = vmatprep.subr.bf16.mxu0 %v2472_v27  ;;  %1233 = vmatmul.mubr.bf16.gmra.mrb[8].mxu0 %v2964_v56  ;;  %v1885_v27 = vcombine.low %v369_v20, %v2948_v35  ;;  %v594_v28 = vrot.slane %v1888_v24, 1  ;;  %v2494_v35 = vld [vmem:[#allocation5 + $0x208] sm:$0xff]  }
  0xaf   : > { %1322 = vmatmul.mubr.bf16.gmra.mrb[8].mxu1 %v3000_v21  ;;  %1239 = vmatprep.mubr.bf16.mxu0 %v3011_v32 }
  0xb0   : > { %1328 = vmatprep.mubr.bf16.mxu1 %v2988_v14  ;;  %2213 = vmatpush3.bf16.msra.mxu1 %v2475_v33  ;;  %v3085_v30 = vsel %vm505_vm1, %v594_v28, %v2983_v9  ;;  %v2495_v33 = vld [vmem:[#allocation5 + $0x210] sm:$0xff]   ;;  %v541_v9 = vshll.u32 %v3068_v17, 16 }
  0xb1   : > { %2149 = vmatpush3.bf16.msra.mxu0 %v2474_v31  ;;  %2214 = vmatprep.subr.bf16.mxu1 %v2478_v40  ;;  %v558_v31 = vrot.slane %v1885_v27, 1  ;;  %v2502_v40 = vld [vmem:[%s2925_s8 + $0x50] ss:$0 sps:$4 sm:$0x11]  }
  0xb2   : > { %2150 = vmatprep.subr.bf16.mxu0 %v2477_v37  ;;  %v545_v37 = vshrl.u32 %v3068_v17, 16  ;;  %v585_v44 = vshll.u32 %v2502_v40, 16  ;;  %v598_v59 = vrot.slane %v2502_v40, 1 }
  0xb3   : > { %v559_v55 = vsel %vm505_vm1, %v558_v31, %v2970_v62  ;;  %v2496_v62 = vld [vmem:[#allocation5 + $0x218] sm:$0xff]  }
  0xb4   : > { %2215 = vmatpush3.bf16.msra.mxu1 %v2480_v42 }
  0xb5   : > { %2151 = vmatpush3.bf16.msra.mxu0 %v2479_v41  ;;  %2216 = vmatprep.subr.bf16.mxu1 %v2483_v48  ;;  %v560_v41 = vrot.slane %v3068_v17, 1 }
  0xb6   : > { %1240 = vmatmul.mubr.bf16.gmra.mrb[12].mxu0 %v2976_v4  ;;  %2152 = vmatprep.subr.bf16.mxu0 %v2482_v47  ;;  %v587_v47 = vrot.slane %v585_v44, 1 }
  0xb7   : > { %1329 = vmatmul.mubr.bf16.gmra.mrb[12].mxu1 %v3020_v36  ;;  %1246 = vmatprep.mubr.bf16.mxu0 %v3027_v45 }
  0xb8   : > { %1335 = vmatprep.mubr.bf16.mxu1 %v3003_v25  ;;  %2217 = vmatpush3.bf16.msra.mxu1 %v2485_v51 }
  0xb9   : > { %2153 = vmatpush3.bf16.msra.mxu0 %v2484_v49  ;;  %2218 = vmatprep.subr.bf16.mxu1 %v2489_v60 }
  0xba   : > { %2154 = vmatprep.subr.bf16.mxu0 %v2488_v57 }
  0xbc   : > { %2219 = vmatpush3.bf16.msra.mxu1 %v2491_v1 }
  0xbd   : > { %2155 = vmatpush3.bf16.msra.mxu0 %v2490_v0  ;;  %2316 = vmatprep.subr.bf16.mxu1 %v2493_v3 }
  0xbe   : > { %1247 = vmatmul.mubr.bf16.gmra.mrb[16].mxu0 %v2988_v14  ;;  %2284 = vmatprep.subr.bf16.mxu0 %v2493_v3 }
  0xbf   : > { %1336 = vmatmul.mubr.bf16.gmra.mrb[16].mxu1 %v3033_v50  ;;  %1253 = vmatprep.mubr.bf16.mxu0 %v3043_v61 }
  0xc0   : > { %1342 = vmatprep.mubr.bf16.mxu1 %v3015_v34 }
  0xc6   : > { %1254 = vmatmul.mubr.bf16.gmra.mrb[20].mxu0 %v3003_v25 }
  0xc7   : > { %1343 = vmatmul.mubr.bf16.gmra.mrb[20].mxu1 %v3050_v5  ;;  %1260 = vmatprep.mubr.bf16.mxu0 %v3058_v11 }
  0xc8   : > { %1349 = vmatprep.mubr.bf16.mxu1 %v3036_v54 }
  0xce   : > { %1261 = vmatmul.mubr.bf16.gmra.mrb[24].mxu0 %v3015_v34 }
  0xcf   : > { %1350 = vmatmul.mubr.bf16.gmra.mrb[24].mxu1 %v3065_v15  ;;  %1267 = vmatprep.mubr.bf16.mxu0 %v493_v26 }
  0xd0   : > { %1356 = vmatprep.mubr.bf16.mxu1 %v3068_v17 }
  0xd6   : > { %1268 = vmatmul.mubr.bf16.gmra.mrb[28].mxu0 %v3036_v54 }
  0xd7   : > { %1357 = vmatmul.mubr.bf16.gmra.mrb[28].mxu1 %v522_v29  ;;  %1396 = vmatprep.mubr.bf16.mxu0 %v559_v55 }
  0xd8   : > { %1485 = vmatprep.mubr.bf16.mxu1 %v2992_v16 }
  0xde   : > { %1397 = vmatmul.mubr.bf16.vlgmr.msra.gmra.mrb[32].mxu0 %v2979_v6  ;;  %v2498_v6 = vld [vmem:[#allocation5 + $0x228] sm:$0xff]  }
  0xdf   : > { %1486 = vmatmul.mubr.bf16.vlgmr.msra.gmra.mrb[32].mxu1 %v2964_v56  ;;  %2285 = vmatpush3.bf16.msra.mxu0 %v2493_v3  ;;  %v2497_v56 = vld [vmem:[#allocation5 + $0x220] sm:$0xff]  }
  0xe0   : > { %2324 = vmatpush3.bf16.msra.mxu1 %v2493_v3  ;;  %1492 = vmatprep.mubr.bf16.mxu1 %v3011_v32 }
  0xe1   : > { %2317 = vmatprep.subr.bf16.mxu1 %v2494_v35  ;;  %1403 = vmatprep.mubr.bf16.mxu0 %v3000_v21  ;;  %v2499_v21 = vld [vmem:[%s2925_s8 + $0x48] sm:$0xff]  }
  0xe2   : > { %2286 = vmatprep.subr.bf16.mxu0 %v2494_v35  ;;  %v581_v43 = vshrl.u32 %v2499_v21, 16  ;;  %v596_v57 = vrot.slane %v2499_v21, 1 }
  0xe3   : > { %2287 = vmatpush3.bf16.msra.mxu0 %v2494_v35 }
  0xe4   : > { %2325 = vmatpush3.bf16.msra.mxu1 %v2494_v35  ;;  %2288 = vmatprep.subr.bf16.mxu0 %v2495_v33  ;;  %v597_v58 = vsel %vm505_vm1, %v560_v41, %v596_v57  ;;  %v599_v60 = vsel %vm505_vm1, %v596_v57, %v598_v59 }
  0xe5   : > { %2318 = vmatprep.subr.bf16.mxu1 %v2495_v33 }
  0xe6   : > { %1404 = vmatmul.mubr.bf16.gmra.mrb[36].mxu0 %v2992_v16  ;;  %v2503_v16 = vld [vmem:[#allocation5 + $0x238] sm:$0xff]  }
  0xe7   : > { %1493 = vmatmul.mubr.bf16.gmra.mrb[36].mxu1 %v2976_v4  ;;  %1410 = vmatprep.mubr.bf16.mxu0 %v3020_v36  ;;  %v2500_v4 = vld [vmem:[#allocation5 + $0x230] sm:$0xff]  }
  0xe8   : > { %1499 = vmatprep.mubr.bf16.mxu1 %v3027_v45  ;;  %2326 = vmatpush3.bf16.msra.mxu1 %v2495_v33 }
  0xe9   : > { %2319 = vmatprep.subr.bf16.mxu1 %v2496_v62  ;;  %2289 = vmatpush3.bf16.msra.mxu0 %v2495_v33 }
  0xea   : > { %2290 = vmatprep.subr.bf16.mxu0 %v2496_v62 }
  0xec   : > { %2327 = vmatpush3.bf16.msra.mxu1 %v2496_v62 }
  0xed   : > { %2320 = vmatprep.subr.bf16.mxu1 %v2497_v56  ;;  %2291 = vmatpush3.bf16.msra.mxu0 %v2496_v62 }
  0xee   : > { %2292 = vmatprep.subr.bf16.mxu0 %v2497_v56  ;;  %1411 = vmatmul.mubr.bf16.gmra.mrb[40].mxu0 %v3011_v32 }
  0xef   : > { %1500 = vmatmul.mubr.bf16.gmra.mrb[40].mxu1 %v2988_v14  ;;  %1417 = vmatprep.mubr.bf16.mxu0 %v3033_v50  ;;  %v543_v14 = vrot.slane %v541_v9, 1 }
  0xf0   : > { %1506 = vmatprep.mubr.bf16.mxu1 %v3043_v61  ;;  %2328 = vmatpush3.bf16.msra.mxu1 %v2497_v56 }
  0xf1   : > { %2321 = vmatprep.subr.bf16.mxu1 %v2498_v6  ;;  %2293 = vmatpush3.bf16.msra.mxu0 %v2497_v56  ;;  %v544_v32 = vsel %vm425_vm0, %v3070_v18, %v543_v14  ;;  %v547_v38 = vor.u32 %v545_v37, %v543_v14 }
  0xf2   : > { %2294 = vmatprep.subr.bf16.mxu0 %v2498_v6 }
  0xf4   : > { %2329 = vmatpush3.bf16.msra.mxu1 %v2498_v6 }
  0xf5   : > { %2322 = vmatprep.subr.bf16.mxu1 %v2500_v4  ;;  %2295 = vmatpush3.bf16.msra.mxu0 %v2498_v6 }
  0xf6   : > { %2296 = vmatprep.subr.bf16.mxu0 %v2500_v4  ;;  %1418 = vmatmul.mubr.bf16.gmra.mrb[44].mxu0 %v3027_v45  ;;  %v2501_v45 = vld [vmem:[%s2925_s8 + $0x48] ss:$0 sps:$4 sm:$0x11]  }
  0xf7   : > { %1507 = vmatmul.mubr.bf16.gmra.mrb[44].mxu1 %v3003_v25  ;;  %1424 = vmatprep.mubr.bf16.mxu0 %v3050_v5  ;;  %v577_v25 = vshll.u32 %v2499_v21, 16  ;;  %v562_v48 = vrot.slane %v2501_v45, 1  ;;  %v549_v51 = vshll.u32 %v2501_v45, 16 }
  0xf8   : > { %1513 = vmatprep.mubr.bf16.mxu1 %v3058_v11  ;;  %2330 = vmatpush3.bf16.msra.mxu1 %v2500_v4 }
  0xf9   : > { %2323 = vmatprep.subr.bf16.mxu1 %v2503_v16  ;;  %2297 = vmatpush3.bf16.msra.mxu0 %v2500_v4  ;;  %v579_v39 = vrot.slane %v577_v25, 1  ;;  %v563_v52 = vsel %vm505_vm1, %v560_v41, %v562_v48  ;;  %v551_v53 = vrot.slane %v549_v51, 1 }
  0xfa   : > { %2298 = vmatprep.subr.bf16.mxu0 %v2503_v16 }
  0xfb   : > { %v580_v42 = vsel %vm425_vm0, %v547_v38, %v579_v39  ;;  %v583_v46 = vor.u32 %v581_v43, %v579_v39 }
  0xfc   : > { %2331 = vmatpush3.bf16.msra.mxu1 %v2503_v16 }
  0xfd   : > { %2299 = vmatpush3.bf16.msra.mxu0 %v2503_v16  ;;  %v588_v49 = vsel %vm425_vm0, %v583_v46, %v587_v47 }
  0xfe   : > { %1425 = vmatmul.mubr.bf16.gmra.mrb[48].mxu0 %v3043_v61 }
  0xff   : > { %1514 = vmatmul.mubr.bf16.gmra.mrb[48].mxu1 %v3015_v34  ;;  %1431 = vmatprep.mubr.bf16.mxu0 %v3065_v15  ;;  %v561_v34 = vsel %vm505_vm1, %v3055_v10, %v560_v41 }
 0x100   : > { %1520 = vmatprep.mubr.bf16.mxu1 %v544_v32 }
 0x106   : > { %1432 = vmatmul.mubr.bf16.gmra.mrb[52].mxu0 %v3058_v11 }
 0x107   : > { %1521 = vmatmul.mubr.bf16.gmra.mrb[52].mxu1 %v3036_v54  ;;  %1438 = vmatprep.mubr.bf16.mxu0 %v561_v34  ;;  %v552_v54 = vsel %vm425_vm0, %v547_v38, %v551_v53 }
 0x108   : > { %1527 = vmatprep.mubr.bf16.mxu1 %v580_v42 }
 0x10e   : > { %1439 = vmatmul.mubr.bf16.gmra.mrb[56].mxu0 %v544_v32 }
 0x10f   : > { %1528 = vmatmul.mubr.bf16.gmra.mrb[56].mxu1 %v3068_v17  ;;  %1445 = vmatprep.mubr.bf16.mxu0 %v563_v52 }
 0x110   : > { %1534 = vmatprep.mubr.bf16.mxu1 %v588_v49 }
 0x116   : > { %1446 = vmatmul.mubr.bf16.gmra.mrb[60].mxu0 %v552_v54 }
 0x117   : > { %1535 = vmatmul.mubr.bf16.gmra.mrb[60].mxu1 %v2499_v21  ;;  %2300 = vmatprep.mubr.bf16.mxu0 %v3085_v30 }
 0x118   : > { %2308 = vmatprep.mubr.bf16.mxu1 %v3065_v15 }
 0x11e   : > { %2301 = vmatmul.mubr.bf16.vlgmr.msra.gmra.mrb[64].mxu0 %v3020_v36 }
 0x11f   : > { %2309 = vmatmul.mubr.bf16.vlgmr.msra.gmra.mrb[64].mxu1 %v561_v34  ;;  %2304 = vmatprep.mubr.bf16.mxu0 %v3033_v50 }
 0x120   : > { %2312 = vmatprep.mubr.bf16.mxu1 %v597_v58 }
 0x126   : > { %2305 = vmatmul.mubr.bf16.gmra.mrb[68].mxu0 %v3050_v5 }
 0x127   : > { %2313 = vmatmul.mubr.bf16.gmra.mrb[68].mxu1 %v599_v60 }
 0x171   : > { %v2028_v3 = vpop.f32.mrb[0].mxu0 }
 0x172   : > { %v2092_v61 = vpop.f32.mrb[0].mxu1  ;;  %v2029_v8 = vpop.f32.mrb[1].mxu0 }
 0x173   : > { %v2093_v63 = vpop.f32.mrb[1].mxu1  ;;  %v2030_v36 = vadd.f32 %v2029_v8, %v2028_v3  ;;  %v2031_v10 = vpop.f32.mrb[2].mxu0 }
 0x174   : > { %v2094_v0 = vadd.f32 %v2093_v63, %v2092_v61  ;;  %v2095_v1 = vpop.f32.mrb[2].mxu1  ;;  %v2032_v50 = vpop.f32.mrb[3].mxu0 }
 0x175   : > { %v2096_v2 = vpop.f32.mrb[3].mxu1  ;;  %v1221_v11 = vadd.f32 %v2030_v36, %v3137_v7 }
 0x177   : > { %v3140_v5 = vadd.f32 %v2094_v0, %v1221_v11 }
 0x179   : > { %v2034_v19 = vpop.f32.mrb[4].mxu0 }
 0x17a   : > { %v2098_v12 = vpop.f32.mrb[4].mxu1  ;;  %v2035_v20 = vpop.f32.mrb[5].mxu0 }
 0x17b   : > { %v2099_v13 = vpop.f32.mrb[5].mxu1  ;;  %v2036_v22 = vadd.f32 %v2035_v20, %v2034_v19  ;;  %v2037_v23 = vpop.f32.mrb[6].mxu0 }
 0x17c   : > { %v2100_v15 = vadd.f32 %v2099_v13, %v2098_v12  ;;  %v2101_v17 = vpop.f32.mrb[6].mxu1  ;;  %v2038_v24 = vpop.f32.mrb[7].mxu0 }
 0x17d   : > { %v2102_v18 = vpop.f32.mrb[7].mxu1  ;;  %v1228_v26 = vadd.f32 %v2036_v22, %v3137_v7 }
 0x17f   : > { %v3143_v29 = vadd.f32 %v2100_v15, %v1228_v26 }
 0x181   : > { %v2040_v35 = vpop.f32.mrb[8].mxu0 }
 0x182   : > { %v2104_v27 = vpop.f32.mrb[8].mxu1  ;;  %v2041_v33 = vpop.f32.mrb[9].mxu0 }
 0x183   : > { %v2105_v28 = vpop.f32.mrb[9].mxu1  ;;  %v2042_v62 = vadd.f32 %v2041_v33, %v2040_v35  ;;  %v2043_v56 = vpop.f32.mrb[10].mxu0 }
 0x184   : > { %v2106_v30 = vadd.f32 %v2105_v28, %v2104_v27  ;;  %v2107_v31 = vpop.f32.mrb[10].mxu1  ;;  %v2044_v6 = vpop.f32.mrb[11].mxu0 }
 0x185   : > { %v2108_v55 = vpop.f32.mrb[11].mxu1  ;;  %v1235_v4 = vadd.f32 %v2042_v62, %v3137_v7 }
 0x187   : > { %v3146_v14 = vadd.f32 %v2106_v30, %v1235_v4 }
 0x189   : > { %v2046_v25 = vpop.f32.mrb[12].mxu0 }
 0x18a   : > { %v2110_v9 = vpop.f32.mrb[12].mxu1  ;;  %v2047_v38 = vpop.f32.mrb[13].mxu0 }
 0x18b   : > { %v2111_v16 = vpop.f32.mrb[13].mxu1  ;;  %v2048_v39 = vadd.f32 %v2047_v38, %v2046_v25  ;;  %v2049_v40 = vpop.f32.mrb[14].mxu0 }
 0x18c   : > { %v2112_v21 = vadd.f32 %v2111_v16, %v2110_v9  ;;  %v2113_v32 = vpop.f32.mrb[14].mxu1  ;;  %v2050_v41 = vpop.f32.mrb[15].mxu0 }
 0x18d   : > { %v2114_v37 = vpop.f32.mrb[15].mxu1  ;;  %v1242_v42 = vadd.f32 %v2048_v39, %v3137_v7 }
 0x18f   : > { %v3149_v34 = vadd.f32 %v2112_v21, %v1242_v42 }
 0x191   : > { %v2052_v48 = vpop.f32.mrb[16].mxu0 }
 0x192   : > { %v2116_v43 = vpop.f32.mrb[16].mxu1  ;;  %v2053_v49 = vpop.f32.mrb[17].mxu0 }
 0x193   : > { %v2117_v44 = vpop.f32.mrb[17].mxu1  ;;  %v2054_v51 = vadd.f32 %v2053_v49, %v2052_v48  ;;  %v2055_v52 = vpop.f32.mrb[18].mxu0 }
 0x194   : > { %v2118_v45 = vadd.f32 %v2117_v44, %v2116_v43  ;;  %v2119_v46 = vpop.f32.mrb[18].mxu1  ;;  %v2056_v53 = vpop.f32.mrb[19].mxu0 }
 0x195   : > { %v2120_v47 = vpop.f32.mrb[19].mxu1  ;;  %v1249_v54 = vadd.f32 %v2054_v51, %v3137_v7 }
 0x197   : > { %v3152_v59 = vadd.f32 %v2118_v45, %v1249_v54 }
 0x199   : > { %v2058_v0 = vpop.f32.mrb[20].mxu0 }
 0x19a   : > { %v2122_v57 = vpop.f32.mrb[20].mxu1  ;;  %v2059_v1 = vpop.f32.mrb[21].mxu0 }
 0x19b   : > { %v2123_v58 = vpop.f32.mrb[21].mxu1  ;;  %v2060_v2 = vadd.f32 %v2059_v1, %v2058_v0  ;;  %v2061_v3 = vpop.f32.mrb[22].mxu0 }
 0x19c   : > { %v2124_v60 = vadd.f32 %v2123_v58, %v2122_v57  ;;  %v2125_v61 = vpop.f32.mrb[22].mxu1  ;;  %v2062_v8 = vpop.f32.mrb[23].mxu0 }
 0x19d   : > { %v2126_v63 = vpop.f32.mrb[23].mxu1  ;;  %v1256_v36 = vadd.f32 %v2060_v2, %v3137_v7 }
 0x19f   : > { %v3155_v11 = vadd.f32 %v2124_v60, %v1256_v36 }
 0x1a1   : > { %v2064_v17 = vpop.f32.mrb[24].mxu0 }
 0x1a2   : > { %v2128_v10 = vpop.f32.mrb[24].mxu1  ;;  %v2065_v18 = vpop.f32.mrb[25].mxu0 }
 0x1a3   : > { %v2129_v50 = vpop.f32.mrb[25].mxu1  ;;  %v2066_v19 = vadd.f32 %v2065_v18, %v2064_v17  ;;  %v2067_v20 = vpop.f32.mrb[26].mxu0 }
 0x1a4   : > { %v2130_v12 = vadd.f32 %v2129_v50, %v2128_v10  ;;  %v2131_v13 = vpop.f32.mrb[26].mxu1  ;;  %v2068_v22 = vpop.f32.mrb[27].mxu0 }
 0x1a5   : > { %v2132_v15 = vpop.f32.mrb[27].mxu1  ;;  %v1263_v23 = vadd.f32 %v2066_v19, %v3137_v7 }
 0x1a7   : > { %v3158_v27 = vadd.f32 %v2130_v12, %v1263_v23 }
 0x1a9   : > { %v2070_v55 = vpop.f32.mrb[28].mxu0 }
 0x1aa   : > { %v2134_v24 = vpop.f32.mrb[28].mxu1  ;;  %v2071_v35 = vpop.f32.mrb[29].mxu0 }
 0x1ab   : > { %v2135_v26 = vpop.f32.mrb[29].mxu1  ;;  %v2072_v33 = vadd.f32 %v2071_v35, %v2070_v55  ;;  %v2073_v62 = vpop.f32.mrb[30].mxu0 }
 0x1ac   : > { %v2136_v28 = vadd.f32 %v2135_v26, %v2134_v24  ;;  %v2137_v30 = vpop.f32.mrb[30].mxu1  ;;  %v2074_v56 = vpop.f32.mrb[31].mxu0 }
 0x1ad   : > { %v2138_v31 = vpop.f32.mrb[31].mxu1  ;;  %v1270_v6 = vadd.f32 %v2072_v33, %v3137_v7 }
 0x1af   : > { %v3161_v16 = vadd.f32 %v2136_v28, %v1270_v6 }
 0x1b1   : > { %v2156_v25 = vpop.f32.mrb[32].mxu0 }
 0x1b2   : > { %v2220_v4 = vpop.f32.mrb[32].mxu1  ;;  %v2157_v38 = vpop.f32.mrb[33].mxu0 }
 0x1b3   : > { %v2221_v9 = vpop.f32.mrb[33].mxu1  ;;  %v2158_v39 = vadd.f32 %v2157_v38, %v2156_v25  ;;  %v2159_v40 = vpop.f32.mrb[34].mxu0 }
 0x1b4   : > { %v2222_v21 = vadd.f32 %v2221_v9, %v2220_v4  ;;  %v2223_v32 = vpop.f32.mrb[34].mxu1  ;;  %v2160_v41 = vpop.f32.mrb[35].mxu0 }
 0x1b5   : > { %v2224_v37 = vpop.f32.mrb[35].mxu1  ;;  %v1399_v42 = vadd.f32 %v2158_v39, %v3140_v5 }
 0x1b7   : > { %v3164_v47 = vadd.f32 %v2222_v21, %v1399_v42 }
 0x1b9   : > { %v2162_v48 = vpop.f32.mrb[36].mxu0 }
 0x1ba   : > { %v2226_v43 = vpop.f32.mrb[36].mxu1  ;;  %v2163_v49 = vpop.f32.mrb[37].mxu0 }
 0x1bb   : > { %v2227_v44 = vpop.f32.mrb[37].mxu1  ;;  %v2164_v51 = vadd.f32 %v2163_v49, %v2162_v48  ;;  %v2165_v52 = vpop.f32.mrb[38].mxu0 }
 0x1bc   : > { %v2228_v45 = vadd.f32 %v2227_v44, %v2226_v43  ;;  %v2229_v46 = vpop.f32.mrb[38].mxu1  ;;  %v2166_v53 = vpop.f32.mrb[39].mxu0 }
 0x1bd   : > { %v2230_v7 = vpop.f32.mrb[39].mxu1  ;;  %v1406_v54 = vadd.f32 %v2164_v51, %v3143_v29 }
 0x1bf   : > { %v3167_v63 = vadd.f32 %v2228_v45, %v1406_v54 }
 0x1c1   : > { %v2168_v0 = vpop.f32.mrb[40].mxu0 }
 0x1c2   : > { %v2232_v57 = vpop.f32.mrb[40].mxu1  ;;  %v2169_v1 = vpop.f32.mrb[41].mxu0 }
 0x1c3   : > { %v2233_v58 = vpop.f32.mrb[41].mxu1  ;;  %v2170_v2 = vadd.f32 %v2169_v1, %v2168_v0  ;;  %v2171_v3 = vpop.f32.mrb[42].mxu0 }
 0x1c4   : > { %v2234_v60 = vadd.f32 %v2233_v58, %v2232_v57  ;;  %v2235_v61 = vpop.f32.mrb[42].mxu1  ;;  %v2172_v8 = vpop.f32.mrb[43].mxu0 }
 0x1c5   : > { %v2236_v5 = vpop.f32.mrb[43].mxu1  ;;  %v1413_v36 = vadd.f32 %v2170_v2, %v3146_v14 }
 0x1c7   : > { %v3170_v15 = vadd.f32 %v2234_v60, %v1413_v36  ;;  %v2007_v36 = vld [vmem:[%s2938_s28 + $0x10] sm:$0xff]  }
 0x1c9   : > { %v2174_v17 = vpop.f32.mrb[44].mxu0 }
 0x1ca   : > { %v2238_v10 = vpop.f32.mrb[44].mxu1  ;;  %v2175_v18 = vpop.f32.mrb[45].mxu0 }
 0x1cb   : > { %v2239_v50 = vpop.f32.mrb[45].mxu1  ;;  %v2176_v19 = vadd.f32 %v2175_v18, %v2174_v17  ;;  %v2177_v20 = vpop.f32.mrb[46].mxu0 }
 0x1cc   : > { %v2240_v12 = vadd.f32 %v2239_v50, %v2238_v10  ;;  %v2241_v13 = vpop.f32.mrb[46].mxu1  ;;  %v2178_v22 = vpop.f32.mrb[47].mxu0  ;;  %v3183_v50 = vld [vmem:[%s3267_s3] ss:$0 sm:$0xff]  ;;  %v1971_v20 = vld [vmem:[%s2938_s28] sm:$0xff]  }
 0x1cd   : > { %v2242_v29 = vpop.f32.mrb[47].mxu1  ;;  %v1420_v23 = vadd.f32 %v2176_v19, %v3149_v34 }
 0x1ce   : > { %v1981_v29 = vunpack.c.h.bf16 %v2007_v36 }
 0x1cf   : > { %v3173_v31 = vadd.f32 %v2240_v12, %v1420_v23  ;;  %v1980_v23 = vunpack.c.l.bf16 %v2007_v36 }
 0x1d1   : > { %v2180_v55 = vpop.f32.mrb[48].mxu0 }
 0x1d2   : > { %v2244_v24 = vpop.f32.mrb[48].mxu1  ;;  %v2181_v35 = vpop.f32.mrb[49].mxu0 }
 0x1d3   : > { %v2245_v26 = vpop.f32.mrb[49].mxu1  ;;  %v2182_v33 = vadd.f32 %v2181_v35, %v2180_v55  ;;  %v2183_v62 = vpop.f32.mrb[50].mxu0  ;;  %v1973_v55 = vunpack.c.h.bf16 %v1971_v20 }
 0x1d4   : > { %v2246_v28 = vadd.f32 %v2245_v26, %v2244_v24  ;;  %v2247_v30 = vpop.f32.mrb[50].mxu1  ;;  %v2184_v56 = vpop.f32.mrb[51].mxu0 }
 0x1d5   : > { %v2248_v14 = vpop.f32.mrb[51].mxu1  ;;  %v1427_v6 = vadd.f32 %v2182_v33, %v3152_v59 }
 0x1d7   : > { %v1516_v37 = vadd.f32 %v2246_v28, %v1427_v6 }
 0x1d9   : > { %v2186_v25 = vpop.f32.mrb[52].mxu0 }
 0x1da   : > { %v2250_v4 = vpop.f32.mrb[52].mxu1  ;;  %v2187_v38 = vpop.f32.mrb[53].mxu0 }
 0x1db   : > { %v2251_v9 = vpop.f32.mrb[53].mxu1  ;;  %v2188_v39 = vadd.f32 %v2187_v38, %v2186_v25  ;;  %v2189_v40 = vpop.f32.mrb[54].mxu0 }
 0x1dc   : > { %v2252_v21 = vadd.f32 %v2251_v9, %v2250_v4  ;;  %v2253_v32 = vpop.f32.mrb[54].mxu1  ;;  %v2190_v41 = vpop.f32.mrb[55].mxu0  ;;  %v1972_v4 = vunpack.c.l.bf16 %v1971_v20 }
 0x1dd   : > { %v2254_v34 = vpop.f32.mrb[55].mxu1  ;;  %v1434_v42 = vadd.f32 %v2188_v39, %v3155_v11  ;;  %v2008_v32 = vld [vmem:[%s2938_s28 + $0x18] sm:$0xff]  }
 0x1de   : > { %v1985_v41 = vunpack.c.h.bf16 %v2008_v32 }
 0x1df   : > { %v1523_v7 = vadd.f32 %v2252_v21, %v1434_v42 }
 0x1e1   : > { %v2192_v59 = vpop.f32.mrb[56].mxu0 }
 0x1e2   : > { %v2256_v43 = vpop.f32.mrb[56].mxu1  ;;  %v2193_v49 = vpop.f32.mrb[57].mxu0 }
 0x1e3   : > { %v2257_v44 = vpop.f32.mrb[57].mxu1  ;;  %v2194_v51 = vadd.f32 %v2193_v49, %v2192_v59  ;;  %v2195_v52 = vpop.f32.mrb[58].mxu0 }
 0x1e4   : > { %v2258_v45 = vadd.f32 %v2257_v44, %v2256_v43  ;;  %v2259_v46 = vpop.f32.mrb[58].mxu1  ;;  %v2196_v53 = vpop.f32.mrb[59].mxu0 }
 0x1e5   : > { %v2260_v48 = vpop.f32.mrb[59].mxu1  ;;  %v1441_v54 = vadd.f32 %v2194_v51, %v3158_v27 }
 0x1e7   : > { %v1530_v5 = vadd.f32 %v2258_v45, %v1441_v54  ;;  %v2006_v45 = vld [vmem:[%s2938_s28 + $0x8] sm:$0xff]  }
 0x1e9   : > { %v2198_v0 = vpop.f32.mrb[60].mxu0 }
 0x1ea   : > { %v2262_v57 = vpop.f32.mrb[60].mxu1  ;;  %v2199_v1 = vpop.f32.mrb[61].mxu0 }
 0x1eb   : > { %v2263_v58 = vpop.f32.mrb[61].mxu1  ;;  %v2200_v2 = vadd.f32 %v2199_v1, %v2198_v0  ;;  %v2201_v3 = vpop.f32.mrb[62].mxu0  ;;  %v1976_v0 = vunpack.c.l.bf16 %v2006_v45 }
 0x1ec   : > { %v2264_v60 = vadd.f32 %v2263_v58, %v2262_v57  ;;  %v2265_v61 = vpop.f32.mrb[62].mxu1  ;;  %v2202_v8 = vpop.f32.mrb[63].mxu0  ;;  %v1977_v57 = vunpack.c.h.bf16 %v2006_v45 }
 0x1ed   : > { %v2266_v11 = vpop.f32.mrb[63].mxu1  ;;  %v1448_v10 = vadd.f32 %v2200_v2, %v3161_v16 }
 0x1ef   : > { %v1537_v19 = vadd.f32 %v2264_v60, %v1448_v10 }
 0x1f1   : > { %v2302_v26 = vpop.f32.mrb[64].mxu0 }
 0x1f2   : > { %v2310_v27 = vpop.f32.mrb[64].mxu1  ;;  %v1584_v28 = vadd.f32 %v2302_v26, %v3167_v63  ;;  %v1576_v14 = vpop.f32.mrb[65].mxu0 }
 0x1f3   : > { %v1612_v12 = vadd.f32 %v2310_v27, %v1523_v7  ;;  %v1604_v13 = vpop.f32.mrb[65].mxu1  ;;  %v1577_v33 = vadd.f32 %v1576_v14, %v3164_v47  ;;  %v2303_v56 = vpop.f32.mrb[66].mxu0  ;;  %v1984_v7 = vunpack.c.l.bf16 %v2008_v32 }
 0x1f4   : > { %v1605_v17 = vadd.f32 %v1604_v13, %v1516_v37  ;;  %v2311_v18 = vpop.f32.mrb[66].mxu1  ;;  %vm1632_vm4 = vcmp.ge.f32.partialorder %v1584_v28, 0.0  ;;  %v1647_v6 = vmul.f32 %v3183_v50, %v1584_v28  ;;  %v1579_v21 = vpop.f32.mrb[67].mxu0 }
 0x1f5   : > { %vm1636_vm2 = vcmp.ge.f32.partialorder %v1612_v12, 0.0  ;;  %v1651_v22 = vmul.f32 %v3183_v50, %v1612_v12  ;;  %v1607_v24 = vpop.f32.mrb[67].mxu1  ;;  %vm1631_vm5 = vcmp.ge.f32.partialorder %v1577_v33, 0.0  ;;  %v1646_v63 = vmul.f32 %v3183_v50, %v1577_v33 }
 0x1f6   : > { %vm1635_vm3 = vcmp.ge.f32.partialorder %v1605_v17, 0.0  ;;  %v1650_v16 = vmul.f32 %v3183_v50, %v1605_v17  ;;  %v1655_v34 = vsel %vm1632_vm4, %v1584_v28, %v1647_v6 }
 0x1f7   : > { %v1659_v30 = vsel %vm1636_vm2, %v1612_v12, %v1651_v22  ;;  %v1679_v47 = vadd.f32 %v1973_v55, %v1655_v34  ;;  %v1654_v40 = vsel %vm1631_vm5, %v1577_v33, %v1646_v63 }
 0x1f8   : > { %v1683_v35 = vadd.f32 %v1981_v29, %v1659_v30  ;;  %v1658_v62 = vsel %vm1635_vm3, %v1605_v17, %v1650_v16  ;;  %v1678_v44 = vadd.f32 %v1972_v4, %v1654_v40 }
 0x1f9   : > { %v1682_v9 = vadd.f32 %v1980_v23, %v1658_v62  ;;  %v2306_v59 = vpop.f32.mrb[68].mxu0 }
 0x1fa   : > { %v2314_v37 = vpop.f32.mrb[68].mxu1  ;;  %v1989_v51 = vpack.c.bf16 %v1679_v47, %v1678_v44  ;;  %v1598_v52 = vadd.f32 %v2306_v59, %v3173_v31  ;;  %v1590_v54 = vpop.f32.mrb[69].mxu0 }
 0x1fb   : > { %v1999_v25 = vpack.c.bf16 %v1683_v35, %v1682_v9  ;;  %v1626_v38 = vadd.f32 %v2314_v37, %v1537_v19  ;;  %v1618_v39 = vpop.f32.mrb[69].mxu1  ;;  %v1591_v60 = vadd.f32 %v1590_v54, %v3170_v15 }
 0x1fc   : > { %v1619_v42 = vadd.f32 %v1618_v39, %v1530_v5  ;;  %v2315_v43 = vpop.f32.mrb[70].mxu1  ;;  %v2307_v5 = vpop.f32.mrb[70].mxu0  ;;  %1990 = vst [vmem:[%s3195_s27] sm:$0xff] %v1989_v51   ;;  %vm1634_vm8 = vcmp.ge.f32.partialorder %v1598_v52, 0.0  ;;  %v1649_v11 = vmul.f32 %v3183_v50, %v1598_v52 }
 0x1fd   : > { %2010 = vst [vmem:[%s3195_s27 + $0x10] sm:$0xff] %v1999_v25   ;;  %vm1638_vm6 = vcmp.ge.f32.partialorder %v1626_v38, 0.0  ;;  %v1653_v46 = vmul.f32 %v3183_v50, %v1626_v38  ;;  %v1621_v48 = vpop.f32.mrb[71].mxu1  ;;  %v1593_v31 = vpop.f32.mrb[71].mxu0  ;;  %vm1633_vm9 = vcmp.ge.f32.partialorder %v1591_v60, 0.0  ;;  %v1648_v2 = vmul.f32 %v3183_v50, %v1591_v60 }
 0x1fe   : > { %vm1637_vm7 = vcmp.ge.f32.partialorder %v1619_v42, 0.0  ;;  %v1652_v49 = vmul.f32 %v3183_v50, %v1619_v42  ;;  %v1657_v3 = vsel %vm1634_vm8, %v1598_v52, %v1649_v11 }
 0x1ff   : > { %v1661_v53 = vsel %vm1638_vm6, %v1626_v38, %v1653_v46  ;;  %v1681_v15 = vadd.f32 %v1977_v57, %v1657_v3  ;;  %v1656_v36 = vsel %vm1633_vm9, %v1591_v60, %v1648_v2 }
 0x200   : > { %v1685_v58 = vadd.f32 %v1985_v41, %v1661_v53  ;;  %v1660_v61 = vsel %vm1637_vm7, %v1619_v42, %v1652_v49  ;;  %v1680_v10 = vadd.f32 %v1976_v0, %v1656_v36 }
 0x201   : > { %v1684_v1 = vadd.f32 %v1984_v7, %v1660_v61 }
 0x202   : > { %v1994_v50 = vpack.c.bf16 %v1681_v15, %v1680_v10 }
 0x203   : > { %v2004_v8 = vpack.c.bf16 %v1685_v58, %v1684_v1 }
 0x204   : > { %2009 = vst [vmem:[%s3195_s27 + $0x8] sm:$0xff] %v1994_v50  }
 0x205   : > { %2011 = vst [vmem:[%s3195_s27 + $0x18] sm:$0xff] %v2004_v8  }
 0x206   : > { %2606 = shalt.err (!%p2603_p5)
}
 0x207   : > { %s2607_s8 = scalar_lea.hbm %s3212_s4, 512  ;;  %s2611_s15 = scalar_lea.hbm %s3269_s5, 1024 }
 0x208   : > { %p2608_p12 = scmp.ne.s32.totalorder %s3212_s4, %s2607_s8  ;;  %p2612_p6 = scmp.lt.u32.totalorder %s3212_s4, %s3269_s5 }
 0x209   : > { %p2613_p1 = scmp.lt.u32.totalorder %s2611_s15, %s2607_s8  ;;  %p2615_p10 = scmp.lt.u32.totalorder %s2607_s8, %s3212_s4 }
 0x20a   : > { %p2609_p11 = pnand %p2608_p12, %p3296_p13 }
 0x20b   : > { %p2614_p8 = por %p2613_p1, %p2612_p6 }
 0x20c   : > { %p2610_p9 = pneg %p2609_p11 }
 0x20d   : > { %p2616_p3 = por %p2615_p10, %p2614_p8 }
 0x20f   : > { %p2617_p7 = pnand %p2616_p3, %p2610_p9 }
 0x211   : > { %2620 = shalt.err (!%p2617_p7)
}
 0x212   : > { %s2691_s6 = smov 64   ;;  %s2692_s27 = smov 4  }
 0x213   : > { %2343 = dma.vmem_to_hbm [thread:$0]  (%p3296_p13), %s3214_s7, 512, %s3212_s4, %s1703_s24, %s2691_s6, %s2691_s6, %s2692_s27  }
 0x214 PF: > { %s1732_s30 = sand.u32 1, %s2663_s18   ;;  %p3297_p0 = scmp.ne.s32.totalorder %s3286_s13, 0 }
 0x215   : > { %p3298_p4 = scmp.ge.s32.totalorder %s2683_s23, 2  ;;  %s1733_s16 = scalar_lea.sflag [#allocation4], %s1732_s30 }
 0x217   : > { %p2357_p2 = pnand %p3298_p4, %p3297_p0 }
 0x219   : > { %2658 = dma.done.wait (!%p2357_p2), %s1733_s16, 512  }
 0x21a   : > { %2660 = vsyncadd (!%p2357_p2), %s1733_s16, 4294966784  ;;  %s22_s23 = sadd.s32 1, %s2683_s23   ;;  %s3299_s11 = sld [smem:[#allocation13_spill]] }
 0x21b   : > { %p19_p5 = scmp.ge.s32.totalorder %s22_s23, 4   ;;  %s3300_s18 = smov %s2667_s19 }
 0x21c   : > { %s3301_s19 = smov %s2671_s20  ;;  %s3302_s20 = smov %s2770_s29 }
 0x21d   : > { %s3303_s21 = smov %s2679_s22  ;;  %21 = sbr.rel (!%p19_p5) target bundleno = 10 (0xa), region = 107 }
 0x220   : > { %s3304_s22 = smov %s3299_s11 }
 0x224   :  { %1738 = vsyncpa [#allocation3], 1 }
 0x225   :  { %1740 = vsyncpa [#allocation3 + $0x1], 1 }
 0x226   :  { %1741 = vsyncpa [#allocation6], 1 }
 0x227   :  { %1742 = vsyncpa [#allocation4], 1 }
 0x228   :  { %1744 = vsyncpa [#allocation4 + $0x1], 1 }

</bundles_post_ra>
